<compile_context>
chip_gen: v6e
topology: v6e:2x2x1
jax: 0.10.0
libtpu: 0.0.40
codegen_flags: <defaults>
</compile_context>

<pallas_src>
import functools

import jax
import jax.numpy as jnp
from jax import lax
from jax.experimental import pallas as pl
from jax.experimental.pallas import tpu as pltpu


def _round_up(v, m):
    return ((v + m - 1) // m) * m


def _graph_conv2d_kernel(x_ref, off_ref, w_ref, o_ref, *, k2, n_real, tn, mxu_dtype):
    # x_ref  : (C_in, N_pad)       -- full (zero-padded) source row range for this batch
    # off_ref: (2*K2, TN)          -- offsets for this output tile
    # w_ref  : (C_out, K2*C_in)    -- weight, k-major flattened: w[o, k*C_in + c]
    # o_ref  : (C_out, TN)
    c_in, n_pad = x_ref.shape
    pad = k2 // 2

    x = x_ref[...].astype(jnp.float32)                       # (C_in, N_pad)
    off = off_ref[...].astype(jnp.float32)                   # (2*K2, TN)

    # Output spatial positions of this tile (lanes) and source rows (sublanes).
    base = (pl.program_id(1) * tn).astype(jnp.float32)
    n_pos = base + lax.broadcasted_iota(jnp.int32, (1, tn), 1).astype(jnp.float32)     # (1, TN)
    m_f = lax.broadcasted_iota(jnp.int32, (n_pad, 1), 0).astype(jnp.float32)           # (N_pad, 1)

    height = jnp.float32(n_real)   # real (unpadded) N; width of the deform-conv "image" is 1
    one = jnp.float32(1.0)
    zero = jnp.float32(0.0)

    x_mxu = x.astype(mxu_dtype)

    sampled = []
    for k in range(k2):  # K2 is small (kernel_size**2, e.g. 9) -> unrolled
        off_y = off[2 * k:2 * k + 1, :]                       # (1, TN)
        off_x = off[2 * k + 1:2 * k + 2, :]                   # (1, TN)

        # torchvision deform-conv sampling coordinate:
        #   h = out_h - pad_h + kh + offset_y ; w = offset_x (W_in = 1, pad_w = 0)
        y = n_pos + jnp.float32(k - pad) + off_y              # (1, TN)

        in_range = (y > -1.0) & (y < height) & (off_x > -1.0) & (off_x < one)
        # bilinear weight along the width-1 axis: hat centered at column 0
        col_w = jnp.maximum(one - jnp.abs(off_x), zero)       # (1, TN)
        col_scale = jnp.where(in_range, col_w, zero)          # (1, TN)

        # Bilinear row weights as a hat function over source rows m in [0, N_pad-1].
        # Rows >= n_real are zero-padded in x, so out-of-range taps contribute 0,
        # matching the h_low/h_high validity masks of the reference semantics.
        s_mat = jnp.maximum(one - jnp.abs(m_f - y), zero) * col_scale   # (N_pad, TN)

        # sampled_k[c, n] = sum_m x[c, m] * S_k[m, n]   (MXU)
        sampled.append(
            jnp.dot(x_mxu, s_mat.astype(mxu_dtype),
                    preferred_element_type=jnp.float32))       # (C_in, TN)

    # Fused channel mixing: one (C_out, K2*C_in) x (K2*C_in, TN) matmul.
    stacked = jnp.concatenate(sampled, axis=0).astype(mxu_dtype)        # (K2*C_in, TN)
    w = w_ref[...].astype(mxu_dtype)                                    # (C_out, K2*C_in)
    out = jnp.dot(w, stacked, preferred_element_type=jnp.float32)       # (C_out, TN)
    o_ref[...] = out.astype(o_ref.dtype)


def graph_conv2d_forward(x, offsets, weight, *, tile_n=256, mxu_dtype=jnp.float32):
    """Pallas implementation of GraphConv2d.forward (bias=False).

    mxu_dtype=jnp.bfloat16 gives 2-4x MXU throughput at ~1e-3 relative error;
    default float32 preserves the exact PyTorch numerics.
    """
    b, c_in, n = x.shape
    c_out, c_in_w, k2, kw = weight.shape
    assert c_in_w == c_in and kw == 1
    assert offsets.shape == (b, 2 * k2, n, 1)
    assert tile_n % 128 == 0

    # Lane-dense layout: pad N to a multiple of 128 and tile it along a grid axis.
    tn = min(tile_n, _round_up(n, 128))
    n_pad = _round_up(n, tn)

    x_p = jnp.pad(x, ((0, 0), (0, 0), (0, n_pad - n)))
    off_p = jnp.pad(offsets[..., 0], ((0, 0), (0, 0), (0, n_pad - n)))
    # weight flattened k-major to match the in-kernel concatenation order:
    #   w_flat[o, k*C_in + c] = weight[o, c, k, 0]
    w_flat = jnp.transpose(weight[..., 0], (0, 2, 1)).reshape(c_out, k2 * c_in)

    kernel = functools.partial(
        _graph_conv2d_kernel, k2=k2, n_real=n, tn=tn, mxu_dtype=mxu_dtype)

    out = pl.pallas_call(
        kernel,
        out_shape=jax.ShapeDtypeStruct((b, c_out, n_pad), x.dtype),
        grid_spec=pltpu.PrefetchScalarGridSpec(
            num_scalar_prefetch=0,
            grid=(b, n_pad // tn),
            in_specs=[
                # full source row range per batch (the deformable gather can reach anywhere)
                pl.BlockSpec((pl.Squeezed(), c_in, n_pad), lambda i, j: (i, 0, 0)),
                # offsets / output are tiled along N
                pl.BlockSpec((pl.Squeezed(), 2 * k2, tn), lambda i, j: (i, 0, j)),
                pl.BlockSpec((c_out, k2 * c_in), lambda i, j: (0, 0)),
            ],
            out_specs=pl.BlockSpec((pl.Squeezed(), c_out, tn), lambda i, j: (i, 0, j)),
        ),
        compiler_params=pltpu.CompilerParams(
            dimension_semantics=("parallel", "parallel")),
    )(x_p, off_p, w_flat)

    # TODO(synk): for very large N the dense (N_pad, TN) sampling matrix is O(N^2) VPU work;
    # switch to a banded window or scalar-prefetch/manual-DMA row gather in that regime.
    return out[:, :, :n]


def _deform_conv_ref(x, offsets, weight):
    """Pure-JAX reference reproducing torchvision DeformConv2d((K^2,1)) semantics."""
    b, c_in, n = x.shape
    c_out, _, k2, _ = weight.shape
    pad = k2 // 2
    off = offsets[..., 0].astype(jnp.float32)
    xf = x.astype(jnp.float32)
    n_pos = jnp.arange(n, dtype=jnp.float32)
    height, width = float(n), 1.0
    out = jnp.zeros((b, c_out, n), jnp.float32)
    for k in range(k2):
        y = n_pos[None, :] + float(k - pad) + off[:, 2 * k]
        xc = off[:, 2 * k + 1]
        in_range = (y > -1.0) & (y < height) & (xc > -1.0) & (xc < width)
        h_low = jnp.floor(y)
        lh = y - h_low
        hh = 1.0 - lh
        x_low = jnp.floor(xc)
        lw = xc - x_low
        hw = 1.0 - lw
        h_low_i = h_low.astype(jnp.int32)
        x_low_i = x_low.astype(jnp.int32)

        def row_gather(hi):
            valid = ((hi >= 0) & (hi <= n - 1)).astype(jnp.float32)
            hic = jnp.clip(hi, 0, n - 1)
            idx = jnp.broadcast_to(hic[:, None, :], (b, c_in, n))
            return jnp.take_along_axis(xf, idx, axis=2) * valid[:, None, :]

        v_low = row_gather(h_low_i)
        v_high = row_gather(h_low_i + 1)
        col_w = (hw * (x_low_i == 0).astype(jnp.float32)
                 + lw * (x_low_i + 1 == 0).astype(jnp.float32))
        mask = in_range.astype(jnp.float32)
        w_low = hh * col_w * mask
        w_high = lh * col_w * mask
        val = v_low * w_low[:, None, :] + v_high * w_high[:, None, :]
        out = out + jnp.einsum('oc,bcn->bon',
                               weight[:, :, k, 0].astype(jnp.float32), val)
    return out


if __name__ == "__main__":
    # GraphConv2d(in_channels=4, out_channels=8, kernel_size=3, bias=False)
    B, C_IN, C_OUT, N, K = 2, 4, 8, 16, 3
    K2 = K * K

    key = jax.random.PRNGKey(0)
    k_x, k_off, k_w = jax.random.split(key, 3)

    x = jax.random.normal(k_x, (B, C_IN, N), dtype=jnp.float32)
    # fractional offsets (some out of range -> exercises zero padding + bilinear interp)
    offsets = jax.random.uniform(k_off, (B, 2 * K2, N, 1),
                                 minval=-3.0, maxval=3.0, dtype=jnp.float32)
    # DeformConv2d weight shape: (C_out, C_in, K^2, 1)
    weight = 0.1 * jax.random.normal(k_w, (C_OUT, C_IN, K2, 1), dtype=jnp.float32)

    out = jax.block_until_ready(graph_conv2d_forward(x, offsets, weight))
    ref = jax.block_until_ready(_deform_conv_ref(x, offsets, weight))
    assert out.shape == (B, C_OUT, N)
    assert jnp.allclose(out, ref, atol=1e-4, rtol=1e-4), "mismatch vs reference (f32)"

    # Optional bf16-MXU fast path (f32 accumulation); numerics ~1e-3 relative.
    out_bf16 = jax.block_until_ready(
        graph_conv2d_forward(x, offsets, weight, mxu_dtype=jnp.bfloat16))
    assert jnp.allclose(out_bf16, ref, atol=5e-2, rtol=5e-2), "mismatch vs reference (bf16)"

    # TODO(synk): get_offsets/get_nearest_neighbors use torch.nonzero with data-dependent
    # output shapes (host-side preprocessing), so they are left outside the kernel.
    print("KERNEL_OK")
</pallas_src>

<mosaic_0001>
module attributes {stable_mosaic.version = 11 : i64} {
  func.func @_graph_conv2d_kernel(%arg0: i32, %arg1: i32, %arg2: memref<1x4x128xf32, #tpu.memory_space<vmem>>, %arg3: memref<1x18x128xf32, #tpu.memory_space<vmem>>, %arg4: memref<8x36xf32, #tpu.memory_space<vmem>>, %arg5: memref<1x8x128xf32, #tpu.memory_space<vmem>>) attributes {dimension_semantics = [#tpu.dimension_semantics<parallel>, #tpu.dimension_semantics<parallel>], iteration_bounds = array<i64: 2, 1>, scalar_prefetch = 0 : i64, scratch_operands = 0 : i64, tpu.core_type = #tpu.core_type<tc>, window_params = [{transform_indices = @transform_0, window_bounds = array<i64: 1, 4, 128>}, {transform_indices = @transform_1, window_bounds = array<i64: 1, 18, 128>}, {pipeline_mode = #tpu.pipeline_mode<synchronous>, transform_indices = @transform_2, window_bounds = array<i64: 8, 36>}, {transform_indices = @transform_3, window_bounds = array<i64: 1, 8, 128>}]} {
    %c0 = arith.constant 0 : index
    %c0_0 = arith.constant 0 : index
    %c0_1 = arith.constant 0 : index
    %0 = vector.load %arg2[%c0, %c0_0, %c0_1] : memref<1x4x128xf32, #tpu.memory_space<vmem>>, vector<1x4x128xf32>
    %1 = vector.shape_cast %0 : vector<1x4x128xf32> to vector<4x128xf32>
    %c0_2 = arith.constant 0 : index
    %c0_3 = arith.constant 0 : index
    %c0_4 = arith.constant 0 : index
    %2 = vector.load %arg3[%c0_2, %c0_3, %c0_4] : memref<1x18x128xf32, #tpu.memory_space<vmem>>, vector<1x18x128xf32>
    %3 = vector.shape_cast %2 : vector<1x18x128xf32> to vector<18x128xf32>
    %c128_i32 = arith.constant 128 : i32
    %4 = arith.muli %arg1, %c128_i32 : i32
    %5 = arith.sitofp %4 : i32 to f32
    %6 = tpu.iota {dimensions = array<i32: 1>} : vector<1x128xi32>
    %7 = arith.sitofp %6 : vector<1x128xi32> to vector<1x128xf32>
    %8 = vector.broadcast %5 : f32 to vector<1x128xf32>
    %9 = arith.addf %8, %7 : vector<1x128xf32>
    %10 = tpu.iota {dimensions = array<i32: 0>} : vector<128x1xi32>
    %11 = arith.sitofp %10 : vector<128x1xi32> to vector<128x1xf32>
    %12 = vector.extract_strided_slice %3 {offsets = [0, 0], sizes = [1, 128], strides = [1, 1]} : vector<18x128xf32> to vector<1x128xf32>
    %13 = vector.extract_strided_slice %3 {offsets = [1, 0], sizes = [1, 128], strides = [1, 1]} : vector<18x128xf32> to vector<1x128xf32>
    %cst = arith.constant -4.000000e+00 : f32
    %14 = vector.broadcast %cst : f32 to vector<1x128xf32>
    %15 = arith.addf %9, %14 : vector<1x128xf32>
    %16 = arith.addf %15, %12 : vector<1x128xf32>
    %cst_5 = arith.constant -1.000000e+00 : f32
    %17 = vector.broadcast %cst_5 : f32 to vector<1x128xf32>
    %18 = arith.cmpf ogt, %16, %17 : vector<1x128xf32>
    %cst_6 = arith.constant 1.600000e+01 : f32
    %19 = vector.broadcast %cst_6 : f32 to vector<1x128xf32>
    %20 = arith.cmpf olt, %16, %19 : vector<1x128xf32>
    %21 = arith.andi %18, %20 : vector<1x128xi1>
    %cst_7 = arith.constant -1.000000e+00 : f32
    %22 = vector.broadcast %cst_7 : f32 to vector<1x128xf32>
    %23 = arith.cmpf ogt, %13, %22 : vector<1x128xf32>
    %24 = arith.andi %21, %23 : vector<1x128xi1>
    %cst_8 = arith.constant 1.000000e+00 : f32
    %25 = vector.broadcast %cst_8 : f32 to vector<1x128xf32>
    %26 = arith.cmpf olt, %13, %25 : vector<1x128xf32>
    %27 = arith.andi %24, %26 : vector<1x128xi1>
    %28 = math.absf %13 : vector<1x128xf32>
    %cst_9 = arith.constant 1.000000e+00 : f32
    %29 = vector.broadcast %cst_9 : f32 to vector<1x128xf32>
    %30 = arith.subf %29, %28 : vector<1x128xf32>
    %cst_10 = arith.constant 0.000000e+00 : f32
    %31 = vector.broadcast %cst_10 : f32 to vector<1x128xf32>
    %32 = arith.maximumf %30, %31 : vector<1x128xf32>
    %cst_11 = arith.constant 0.000000e+00 : f32
    %33 = vector.broadcast %cst_11 : f32 to vector<1x128xf32>
    %34 = arith.select %27, %32, %33 : vector<1x128xi1>, vector<1x128xf32>
    %35 = vector.broadcast %11 : vector<128x1xf32> to vector<128x128xf32>
    %36 = vector.broadcast %16 : vector<1x128xf32> to vector<128x128xf32>
    %37 = arith.subf %35, %36 : vector<128x128xf32>
    %38 = math.absf %37 : vector<128x128xf32>
    %cst_12 = arith.constant 1.000000e+00 : f32
    %39 = vector.broadcast %cst_12 : f32 to vector<128x128xf32>
    %40 = arith.subf %39, %38 : vector<128x128xf32>
    %cst_13 = arith.constant 0.000000e+00 : f32
    %41 = vector.broadcast %cst_13 : f32 to vector<128x128xf32>
    %42 = arith.maximumf %40, %41 : vector<128x128xf32>
    %43 = vector.broadcast %34 : vector<1x128xf32> to vector<128x128xf32>
    %44 = arith.mulf %42, %43 : vector<128x128xf32>
    %cst_14 = arith.constant dense<0.000000e+00> : vector<4x128xf32>
    %45 = tpu.matmul %1, %44, %cst_14 {dimension_numbers = #tpu.dot_dimension_numbers<[1], [0], [0], [1], [0, 0, 1, 1], [], []>} : vector<4x128xf32>, vector<128x128xf32>, vector<4x128xf32> -> vector<4x128xf32>
    %46 = vector.extract_strided_slice %3 {offsets = [2, 0], sizes = [1, 128], strides = [1, 1]} : vector<18x128xf32> to vector<1x128xf32>
    %47 = vector.extract_strided_slice %3 {offsets = [3, 0], sizes = [1, 128], strides = [1, 1]} : vector<18x128xf32> to vector<1x128xf32>
    %cst_15 = arith.constant -3.000000e+00 : f32
    %48 = vector.broadcast %cst_15 : f32 to vector<1x128xf32>
    %49 = arith.addf %9, %48 : vector<1x128xf32>
    %50 = arith.addf %49, %46 : vector<1x128xf32>
    %cst_16 = arith.constant -1.000000e+00 : f32
    %51 = vector.broadcast %cst_16 : f32 to vector<1x128xf32>
    %52 = arith.cmpf ogt, %50, %51 : vector<1x128xf32>
    %cst_17 = arith.constant 1.600000e+01 : f32
    %53 = vector.broadcast %cst_17 : f32 to vector<1x128xf32>
    %54 = arith.cmpf olt, %50, %53 : vector<1x128xf32>
    %55 = arith.andi %52, %54 : vector<1x128xi1>
    %cst_18 = arith.constant -1.000000e+00 : f32
    %56 = vector.broadcast %cst_18 : f32 to vector<1x128xf32>
    %57 = arith.cmpf ogt, %47, %56 : vector<1x128xf32>
    %58 = arith.andi %55, %57 : vector<1x128xi1>
    %cst_19 = arith.constant 1.000000e+00 : f32
    %59 = vector.broadcast %cst_19 : f32 to vector<1x128xf32>
    %60 = arith.cmpf olt, %47, %59 : vector<1x128xf32>
    %61 = arith.andi %58, %60 : vector<1x128xi1>
    %62 = math.absf %47 : vector<1x128xf32>
    %cst_20 = arith.constant 1.000000e+00 : f32
    %63 = vector.broadcast %cst_20 : f32 to vector<1x128xf32>
    %64 = arith.subf %63, %62 : vector<1x128xf32>
    %cst_21 = arith.constant 0.000000e+00 : f32
    %65 = vector.broadcast %cst_21 : f32 to vector<1x128xf32>
    %66 = arith.maximumf %64, %65 : vector<1x128xf32>
    %cst_22 = arith.constant 0.000000e+00 : f32
    %67 = vector.broadcast %cst_22 : f32 to vector<1x128xf32>
    %68 = arith.select %61, %66, %67 : vector<1x128xi1>, vector<1x128xf32>
    %69 = vector.broadcast %11 : vector<128x1xf32> to vector<128x128xf32>
    %70 = vector.broadcast %50 : vector<1x128xf32> to vector<128x128xf32>
    %71 = arith.subf %69, %70 : vector<128x128xf32>
    %72 = math.absf %71 : vector<128x128xf32>
    %cst_23 = arith.constant 1.000000e+00 : f32
    %73 = vector.broadcast %cst_23 : f32 to vector<128x128xf32>
    %74 = arith.subf %73, %72 : vector<128x128xf32>
    %cst_24 = arith.constant 0.000000e+00 : f32
    %75 = vector.broadcast %cst_24 : f32 to vector<128x128xf32>
    %76 = arith.maximumf %74, %75 : vector<128x128xf32>
    %77 = vector.broadcast %68 : vector<1x128xf32> to vector<128x128xf32>
    %78 = arith.mulf %76, %77 : vector<128x128xf32>
    %cst_25 = arith.constant dense<0.000000e+00> : vector<4x128xf32>
    %79 = tpu.matmul %1, %78, %cst_25 {dimension_numbers = #tpu.dot_dimension_numbers<[1], [0], [0], [1], [0, 0, 1, 1], [], []>} : vector<4x128xf32>, vector<128x128xf32>, vector<4x128xf32> -> vector<4x128xf32>
    %80 = vector.extract_strided_slice %3 {offsets = [4, 0], sizes = [1, 128], strides = [1, 1]} : vector<18x128xf32> to vector<1x128xf32>
    %81 = vector.extract_strided_slice %3 {offsets = [5, 0], sizes = [1, 128], strides = [1, 1]} : vector<18x128xf32> to vector<1x128xf32>
    %cst_26 = arith.constant -2.000000e+00 : f32
    %82 = vector.broadcast %cst_26 : f32 to vector<1x128xf32>
    %83 = arith.addf %9, %82 : vector<1x128xf32>
    %84 = arith.addf %83, %80 : vector<1x128xf32>
    %cst_27 = arith.constant -1.000000e+00 : f32
    %85 = vector.broadcast %cst_27 : f32 to vector<1x128xf32>
    %86 = arith.cmpf ogt, %84, %85 : vector<1x128xf32>
    %cst_28 = arith.constant 1.600000e+01 : f32
    %87 = vector.broadcast %cst_28 : f32 to vector<1x128xf32>
    %88 = arith.cmpf olt, %84, %87 : vector<1x128xf32>
    %89 = arith.andi %86, %88 : vector<1x128xi1>
    %cst_29 = arith.constant -1.000000e+00 : f32
    %90 = vector.broadcast %cst_29 : f32 to vector<1x128xf32>
    %91 = arith.cmpf ogt, %81, %90 : vector<1x128xf32>
    %92 = arith.andi %89, %91 : vector<1x128xi1>
    %cst_30 = arith.constant 1.000000e+00 : f32
    %93 = vector.broadcast %cst_30 : f32 to vector<1x128xf32>
    %94 = arith.cmpf olt, %81, %93 : vector<1x128xf32>
    %95 = arith.andi %92, %94 : vector<1x128xi1>
    %96 = math.absf %81 : vector<1x128xf32>
    %cst_31 = arith.constant 1.000000e+00 : f32
    %97 = vector.broadcast %cst_31 : f32 to vector<1x128xf32>
    %98 = arith.subf %97, %96 : vector<1x128xf32>
    %cst_32 = arith.constant 0.000000e+00 : f32
    %99 = vector.broadcast %cst_32 : f32 to vector<1x128xf32>
    %100 = arith.maximumf %98, %99 : vector<1x128xf32>
    %cst_33 = arith.constant 0.000000e+00 : f32
    %101 = vector.broadcast %cst_33 : f32 to vector<1x128xf32>
    %102 = arith.select %95, %100, %101 : vector<1x128xi1>, vector<1x128xf32>
    %103 = vector.broadcast %11 : vector<128x1xf32> to vector<128x128xf32>
    %104 = vector.broadcast %84 : vector<1x128xf32> to vector<128x128xf32>
    %105 = arith.subf %103, %104 : vector<128x128xf32>
    %106 = math.absf %105 : vector<128x128xf32>
    %cst_34 = arith.constant 1.000000e+00 : f32
    %107 = vector.broadcast %cst_34 : f32 to vector<128x128xf32>
    %108 = arith.subf %107, %106 : vector<128x128xf32>
    %cst_35 = arith.constant 0.000000e+00 : f32
    %109 = vector.broadcast %cst_35 : f32 to vector<128x128xf32>
    %110 = arith.maximumf %108, %109 : vector<128x128xf32>
    %111 = vector.broadcast %102 : vector<1x128xf32> to vector<128x128xf32>
    %112 = arith.mulf %110, %111 : vector<128x128xf32>
    %cst_36 = arith.constant dense<0.000000e+00> : vector<4x128xf32>
    %113 = tpu.matmul %1, %112, %cst_36 {dimension_numbers = #tpu.dot_dimension_numbers<[1], [0], [0], [1], [0, 0, 1, 1], [], []>} : vector<4x128xf32>, vector<128x128xf32>, vector<4x128xf32> -> vector<4x128xf32>
    %114 = vector.extract_strided_slice %3 {offsets = [6, 0], sizes = [1, 128], strides = [1, 1]} : vector<18x128xf32> to vector<1x128xf32>
    %115 = vector.extract_strided_slice %3 {offsets = [7, 0], sizes = [1, 128], strides = [1, 1]} : vector<18x128xf32> to vector<1x128xf32>
    %cst_37 = arith.constant -1.000000e+00 : f32
    %116 = vector.broadcast %cst_37 : f32 to vector<1x128xf32>
    %117 = arith.addf %9, %116 : vector<1x128xf32>
    %118 = arith.addf %117, %114 : vector<1x128xf32>
    %cst_38 = arith.constant -1.000000e+00 : f32
    %119 = vector.broadcast %cst_38 : f32 to vector<1x128xf32>
    %120 = arith.cmpf ogt, %118, %119 : vector<1x128xf32>
    %cst_39 = arith.constant 1.600000e+01 : f32
    %121 = vector.broadcast %cst_39 : f32 to vector<1x128xf32>
    %122 = arith.cmpf olt, %118, %121 : vector<1x128xf32>
    %123 = arith.andi %120, %122 : vector<1x128xi1>
    %cst_40 = arith.constant -1.000000e+00 : f32
    %124 = vector.broadcast %cst_40 : f32 to vector<1x128xf32>
    %125 = arith.cmpf ogt, %115, %124 : vector<1x128xf32>
    %126 = arith.andi %123, %125 : vector<1x128xi1>
    %cst_41 = arith.constant 1.000000e+00 : f32
    %127 = vector.broadcast %cst_41 : f32 to vector<1x128xf32>
    %128 = arith.cmpf olt, %115, %127 : vector<1x128xf32>
    %129 = arith.andi %126, %128 : vector<1x128xi1>
    %130 = math.absf %115 : vector<1x128xf32>
    %cst_42 = arith.constant 1.000000e+00 : f32
    %131 = vector.broadcast %cst_42 : f32 to vector<1x128xf32>
    %132 = arith.subf %131, %130 : vector<1x128xf32>
    %cst_43 = arith.constant 0.000000e+00 : f32
    %133 = vector.broadcast %cst_43 : f32 to vector<1x128xf32>
    %134 = arith.maximumf %132, %133 : vector<1x128xf32>
    %cst_44 = arith.constant 0.000000e+00 : f32
    %135 = vector.broadcast %cst_44 : f32 to vector<1x128xf32>
    %136 = arith.select %129, %134, %135 : vector<1x128xi1>, vector<1x128xf32>
    %137 = vector.broadcast %11 : vector<128x1xf32> to vector<128x128xf32>
    %138 = vector.broadcast %118 : vector<1x128xf32> to vector<128x128xf32>
    %139 = arith.subf %137, %138 : vector<128x128xf32>
    %140 = math.absf %139 : vector<128x128xf32>
    %cst_45 = arith.constant 1.000000e+00 : f32
    %141 = vector.broadcast %cst_45 : f32 to vector<128x128xf32>
    %142 = arith.subf %141, %140 : vector<128x128xf32>
    %cst_46 = arith.constant 0.000000e+00 : f32
    %143 = vector.broadcast %cst_46 : f32 to vector<128x128xf32>
    %144 = arith.maximumf %142, %143 : vector<128x128xf32>
    %145 = vector.broadcast %136 : vector<1x128xf32> to vector<128x128xf32>
    %146 = arith.mulf %144, %145 : vector<128x128xf32>
    %cst_47 = arith.constant dense<0.000000e+00> : vector<4x128xf32>
    %147 = tpu.matmul %1, %146, %cst_47 {dimension_numbers = #tpu.dot_dimension_numbers<[1], [0], [0], [1], [0, 0, 1, 1], [], []>} : vector<4x128xf32>, vector<128x128xf32>, vector<4x128xf32> -> vector<4x128xf32>
    %148 = vector.extract_strided_slice %3 {offsets = [8, 0], sizes = [1, 128], strides = [1, 1]} : vector<18x128xf32> to vector<1x128xf32>
    %149 = vector.extract_strided_slice %3 {offsets = [9, 0], sizes = [1, 128], strides = [1, 1]} : vector<18x128xf32> to vector<1x128xf32>
    %cst_48 = arith.constant 0.000000e+00 : f32
    %150 = vector.broadcast %cst_48 : f32 to vector<1x128xf32>
    %151 = arith.addf %9, %150 : vector<1x128xf32>
    %152 = arith.addf %151, %148 : vector<1x128xf32>
    %cst_49 = arith.constant -1.000000e+00 : f32
    %153 = vector.broadcast %cst_49 : f32 to vector<1x128xf32>
    %154 = arith.cmpf ogt, %152, %153 : vector<1x128xf32>
    %cst_50 = arith.constant 1.600000e+01 : f32
    %155 = vector.broadcast %cst_50 : f32 to vector<1x128xf32>
    %156 = arith.cmpf olt, %152, %155 : vector<1x128xf32>
    %157 = arith.andi %154, %156 : vector<1x128xi1>
    %cst_51 = arith.constant -1.000000e+00 : f32
    %158 = vector.broadcast %cst_51 : f32 to vector<1x128xf32>
    %159 = arith.cmpf ogt, %149, %158 : vector<1x128xf32>
    %160 = arith.andi %157, %159 : vector<1x128xi1>
    %cst_52 = arith.constant 1.000000e+00 : f32
    %161 = vector.broadcast %cst_52 : f32 to vector<1x128xf32>
    %162 = arith.cmpf olt, %149, %161 : vector<1x128xf32>
    %163 = arith.andi %160, %162 : vector<1x128xi1>
    %164 = math.absf %149 : vector<1x128xf32>
    %cst_53 = arith.constant 1.000000e+00 : f32
    %165 = vector.broadcast %cst_53 : f32 to vector<1x128xf32>
    %166 = arith.subf %165, %164 : vector<1x128xf32>
    %cst_54 = arith.constant 0.000000e+00 : f32
    %167 = vector.broadcast %cst_54 : f32 to vector<1x128xf32>
    %168 = arith.maximumf %166, %167 : vector<1x128xf32>
    %cst_55 = arith.constant 0.000000e+00 : f32
    %169 = vector.broadcast %cst_55 : f32 to vector<1x128xf32>
    %170 = arith.select %163, %168, %169 : vector<1x128xi1>, vector<1x128xf32>
    %171 = vector.broadcast %11 : vector<128x1xf32> to vector<128x128xf32>
    %172 = vector.broadcast %152 : vector<1x128xf32> to vector<128x128xf32>
    %173 = arith.subf %171, %172 : vector<128x128xf32>
    %174 = math.absf %173 : vector<128x128xf32>
    %cst_56 = arith.constant 1.000000e+00 : f32
    %175 = vector.broadcast %cst_56 : f32 to vector<128x128xf32>
    %176 = arith.subf %175, %174 : vector<128x128xf32>
    %cst_57 = arith.constant 0.000000e+00 : f32
    %177 = vector.broadcast %cst_57 : f32 to vector<128x128xf32>
    %178 = arith.maximumf %176, %177 : vector<128x128xf32>
    %179 = vector.broadcast %170 : vector<1x128xf32> to vector<128x128xf32>
    %180 = arith.mulf %178, %179 : vector<128x128xf32>
    %cst_58 = arith.constant dense<0.000000e+00> : vector<4x128xf32>
    %181 = tpu.matmul %1, %180, %cst_58 {dimension_numbers = #tpu.dot_dimension_numbers<[1], [0], [0], [1], [0, 0, 1, 1], [], []>} : vector<4x128xf32>, vector<128x128xf32>, vector<4x128xf32> -> vector<4x128xf32>
    %182 = vector.extract_strided_slice %3 {offsets = [10, 0], sizes = [1, 128], strides = [1, 1]} : vector<18x128xf32> to vector<1x128xf32>
    %183 = vector.extract_strided_slice %3 {offsets = [11, 0], sizes = [1, 128], strides = [1, 1]} : vector<18x128xf32> to vector<1x128xf32>
    %cst_59 = arith.constant 1.000000e+00 : f32
    %184 = vector.broadcast %cst_59 : f32 to vector<1x128xf32>
    %185 = arith.addf %9, %184 : vector<1x128xf32>
    %186 = arith.addf %185, %182 : vector<1x128xf32>
    %cst_60 = arith.constant -1.000000e+00 : f32
    %187 = vector.broadcast %cst_60 : f32 to vector<1x128xf32>
    %188 = arith.cmpf ogt, %186, %187 : vector<1x128xf32>
    %cst_61 = arith.constant 1.600000e+01 : f32
    %189 = vector.broadcast %cst_61 : f32 to vector<1x128xf32>
    %190 = arith.cmpf olt, %186, %189 : vector<1x128xf32>
    %191 = arith.andi %188, %190 : vector<1x128xi1>
    %cst_62 = arith.constant -1.000000e+00 : f32
    %192 = vector.broadcast %cst_62 : f32 to vector<1x128xf32>
    %193 = arith.cmpf ogt, %183, %192 : vector<1x128xf32>
    %194 = arith.andi %191, %193 : vector<1x128xi1>
    %cst_63 = arith.constant 1.000000e+00 : f32
    %195 = vector.broadcast %cst_63 : f32 to vector<1x128xf32>
    %196 = arith.cmpf olt, %183, %195 : vector<1x128xf32>
    %197 = arith.andi %194, %196 : vector<1x128xi1>
    %198 = math.absf %183 : vector<1x128xf32>
    %cst_64 = arith.constant 1.000000e+00 : f32
    %199 = vector.broadcast %cst_64 : f32 to vector<1x128xf32>
    %200 = arith.subf %199, %198 : vector<1x128xf32>
    %cst_65 = arith.constant 0.000000e+00 : f32
    %201 = vector.broadcast %cst_65 : f32 to vector<1x128xf32>
    %202 = arith.maximumf %200, %201 : vector<1x128xf32>
    %cst_66 = arith.constant 0.000000e+00 : f32
    %203 = vector.broadcast %cst_66 : f32 to vector<1x128xf32>
    %204 = arith.select %197, %202, %203 : vector<1x128xi1>, vector<1x128xf32>
    %205 = vector.broadcast %11 : vector<128x1xf32> to vector<128x128xf32>
    %206 = vector.broadcast %186 : vector<1x128xf32> to vector<128x128xf32>
    %207 = arith.subf %205, %206 : vector<128x128xf32>
    %208 = math.absf %207 : vector<128x128xf32>
    %cst_67 = arith.constant 1.000000e+00 : f32
    %209 = vector.broadcast %cst_67 : f32 to vector<128x128xf32>
    %210 = arith.subf %209, %208 : vector<128x128xf32>
    %cst_68 = arith.constant 0.000000e+00 : f32
    %211 = vector.broadcast %cst_68 : f32 to vector<128x128xf32>
    %212 = arith.maximumf %210, %211 : vector<128x128xf32>
    %213 = vector.broadcast %204 : vector<1x128xf32> to vector<128x128xf32>
    %214 = arith.mulf %212, %213 : vector<128x128xf32>
    %cst_69 = arith.constant dense<0.000000e+00> : vector<4x128xf32>
    %215 = tpu.matmul %1, %214, %cst_69 {dimension_numbers = #tpu.dot_dimension_numbers<[1], [0], [0], [1], [0, 0, 1, 1], [], []>} : vector<4x128xf32>, vector<128x128xf32>, vector<4x128xf32> -> vector<4x128xf32>
    %216 = vector.extract_strided_slice %3 {offsets = [12, 0], sizes = [1, 128], strides = [1, 1]} : vector<18x128xf32> to vector<1x128xf32>
    %217 = vector.extract_strided_slice %3 {offsets = [13, 0], sizes = [1, 128], strides = [1, 1]} : vector<18x128xf32> to vector<1x128xf32>
    %cst_70 = arith.constant 2.000000e+00 : f32
    %218 = vector.broadcast %cst_70 : f32 to vector<1x128xf32>
    %219 = arith.addf %9, %218 : vector<1x128xf32>
    %220 = arith.addf %219, %216 : vector<1x128xf32>
    %cst_71 = arith.constant -1.000000e+00 : f32
    %221 = vector.broadcast %cst_71 : f32 to vector<1x128xf32>
    %222 = arith.cmpf ogt, %220, %221 : vector<1x128xf32>
    %cst_72 = arith.constant 1.600000e+01 : f32
    %223 = vector.broadcast %cst_72 : f32 to vector<1x128xf32>
    %224 = arith.cmpf olt, %220, %223 : vector<1x128xf32>
    %225 = arith.andi %222, %224 : vector<1x128xi1>
    %cst_73 = arith.constant -1.000000e+00 : f32
    %226 = vector.broadcast %cst_73 : f32 to vector<1x128xf32>
    %227 = arith.cmpf ogt, %217, %226 : vector<1x128xf32>
    %228 = arith.andi %225, %227 : vector<1x128xi1>
    %cst_74 = arith.constant 1.000000e+00 : f32
    %229 = vector.broadcast %cst_74 : f32 to vector<1x128xf32>
    %230 = arith.cmpf olt, %217, %229 : vector<1x128xf32>
    %231 = arith.andi %228, %230 : vector<1x128xi1>
    %232 = math.absf %217 : vector<1x128xf32>
    %cst_75 = arith.constant 1.000000e+00 : f32
    %233 = vector.broadcast %cst_75 : f32 to vector<1x128xf32>
    %234 = arith.subf %233, %232 : vector<1x128xf32>
    %cst_76 = arith.constant 0.000000e+00 : f32
    %235 = vector.broadcast %cst_76 : f32 to vector<1x128xf32>
    %236 = arith.maximumf %234, %235 : vector<1x128xf32>
    %cst_77 = arith.constant 0.000000e+00 : f32
    %237 = vector.broadcast %cst_77 : f32 to vector<1x128xf32>
    %238 = arith.select %231, %236, %237 : vector<1x128xi1>, vector<1x128xf32>
    %239 = vector.broadcast %11 : vector<128x1xf32> to vector<128x128xf32>
    %240 = vector.broadcast %220 : vector<1x128xf32> to vector<128x128xf32>
    %241 = arith.subf %239, %240 : vector<128x128xf32>
    %242 = math.absf %241 : vector<128x128xf32>
    %cst_78 = arith.constant 1.000000e+00 : f32
    %243 = vector.broadcast %cst_78 : f32 to vector<128x128xf32>
    %244 = arith.subf %243, %242 : vector<128x128xf32>
    %cst_79 = arith.constant 0.000000e+00 : f32
    %245 = vector.broadcast %cst_79 : f32 to vector<128x128xf32>
    %246 = arith.maximumf %244, %245 : vector<128x128xf32>
    %247 = vector.broadcast %238 : vector<1x128xf32> to vector<128x128xf32>
    %248 = arith.mulf %246, %247 : vector<128x128xf32>
    %cst_80 = arith.constant dense<0.000000e+00> : vector<4x128xf32>
    %249 = tpu.matmul %1, %248, %cst_80 {dimension_numbers = #tpu.dot_dimension_numbers<[1], [0], [0], [1], [0, 0, 1, 1], [], []>} : vector<4x128xf32>, vector<128x128xf32>, vector<4x128xf32> -> vector<4x128xf32>
    %250 = vector.extract_strided_slice %3 {offsets = [14, 0], sizes = [1, 128], strides = [1, 1]} : vector<18x128xf32> to vector<1x128xf32>
    %251 = vector.extract_strided_slice %3 {offsets = [15, 0], sizes = [1, 128], strides = [1, 1]} : vector<18x128xf32> to vector<1x128xf32>
    %cst_81 = arith.constant 3.000000e+00 : f32
    %252 = vector.broadcast %cst_81 : f32 to vector<1x128xf32>
    %253 = arith.addf %9, %252 : vector<1x128xf32>
    %254 = arith.addf %253, %250 : vector<1x128xf32>
    %cst_82 = arith.constant -1.000000e+00 : f32
    %255 = vector.broadcast %cst_82 : f32 to vector<1x128xf32>
    %256 = arith.cmpf ogt, %254, %255 : vector<1x128xf32>
    %cst_83 = arith.constant 1.600000e+01 : f32
    %257 = vector.broadcast %cst_83 : f32 to vector<1x128xf32>
    %258 = arith.cmpf olt, %254, %257 : vector<1x128xf32>
    %259 = arith.andi %256, %258 : vector<1x128xi1>
    %cst_84 = arith.constant -1.000000e+00 : f32
    %260 = vector.broadcast %cst_84 : f32 to vector<1x128xf32>
    %261 = arith.cmpf ogt, %251, %260 : vector<1x128xf32>
    %262 = arith.andi %259, %261 : vector<1x128xi1>
    %cst_85 = arith.constant 1.000000e+00 : f32
    %263 = vector.broadcast %cst_85 : f32 to vector<1x128xf32>
    %264 = arith.cmpf olt, %251, %263 : vector<1x128xf32>
    %265 = arith.andi %262, %264 : vector<1x128xi1>
    %266 = math.absf %251 : vector<1x128xf32>
    %cst_86 = arith.constant 1.000000e+00 : f32
    %267 = vector.broadcast %cst_86 : f32 to vector<1x128xf32>
    %268 = arith.subf %267, %266 : vector<1x128xf32>
    %cst_87 = arith.constant 0.000000e+00 : f32
    %269 = vector.broadcast %cst_87 : f32 to vector<1x128xf32>
    %270 = arith.maximumf %268, %269 : vector<1x128xf32>
    %cst_88 = arith.constant 0.000000e+00 : f32
    %271 = vector.broadcast %cst_88 : f32 to vector<1x128xf32>
    %272 = arith.select %265, %270, %271 : vector<1x128xi1>, vector<1x128xf32>
    %273 = vector.broadcast %11 : vector<128x1xf32> to vector<128x128xf32>
    %274 = vector.broadcast %254 : vector<1x128xf32> to vector<128x128xf32>
    %275 = arith.subf %273, %274 : vector<128x128xf32>
    %276 = math.absf %275 : vector<128x128xf32>
    %cst_89 = arith.constant 1.000000e+00 : f32
    %277 = vector.broadcast %cst_89 : f32 to vector<128x128xf32>
    %278 = arith.subf %277, %276 : vector<128x128xf32>
    %cst_90 = arith.constant 0.000000e+00 : f32
    %279 = vector.broadcast %cst_90 : f32 to vector<128x128xf32>
    %280 = arith.maximumf %278, %279 : vector<128x128xf32>
    %281 = vector.broadcast %272 : vector<1x128xf32> to vector<128x128xf32>
    %282 = arith.mulf %280, %281 : vector<128x128xf32>
    %cst_91 = arith.constant dense<0.000000e+00> : vector<4x128xf32>
    %283 = tpu.matmul %1, %282, %cst_91 {dimension_numbers = #tpu.dot_dimension_numbers<[1], [0], [0], [1], [0, 0, 1, 1], [], []>} : vector<4x128xf32>, vector<128x128xf32>, vector<4x128xf32> -> vector<4x128xf32>
    %284 = vector.extract_strided_slice %3 {offsets = [16, 0], sizes = [1, 128], strides = [1, 1]} : vector<18x128xf32> to vector<1x128xf32>
    %285 = vector.extract_strided_slice %3 {offsets = [17, 0], sizes = [1, 128], strides = [1, 1]} : vector<18x128xf32> to vector<1x128xf32>
    %cst_92 = arith.constant 4.000000e+00 : f32
    %286 = vector.broadcast %cst_92 : f32 to vector<1x128xf32>
    %287 = arith.addf %9, %286 : vector<1x128xf32>
    %288 = arith.addf %287, %284 : vector<1x128xf32>
    %cst_93 = arith.constant -1.000000e+00 : f32
    %289 = vector.broadcast %cst_93 : f32 to vector<1x128xf32>
    %290 = arith.cmpf ogt, %288, %289 : vector<1x128xf32>
    %cst_94 = arith.constant 1.600000e+01 : f32
    %291 = vector.broadcast %cst_94 : f32 to vector<1x128xf32>
    %292 = arith.cmpf olt, %288, %291 : vector<1x128xf32>
    %293 = arith.andi %290, %292 : vector<1x128xi1>
    %cst_95 = arith.constant -1.000000e+00 : f32
    %294 = vector.broadcast %cst_95 : f32 to vector<1x128xf32>
    %295 = arith.cmpf ogt, %285, %294 : vector<1x128xf32>
    %296 = arith.andi %293, %295 : vector<1x128xi1>
    %cst_96 = arith.constant 1.000000e+00 : f32
    %297 = vector.broadcast %cst_96 : f32 to vector<1x128xf32>
    %298 = arith.cmpf olt, %285, %297 : vector<1x128xf32>
    %299 = arith.andi %296, %298 : vector<1x128xi1>
    %300 = math.absf %285 : vector<1x128xf32>
    %cst_97 = arith.constant 1.000000e+00 : f32
    %301 = vector.broadcast %cst_97 : f32 to vector<1x128xf32>
    %302 = arith.subf %301, %300 : vector<1x128xf32>
    %cst_98 = arith.constant 0.000000e+00 : f32
    %303 = vector.broadcast %cst_98 : f32 to vector<1x128xf32>
    %304 = arith.maximumf %302, %303 : vector<1x128xf32>
    %cst_99 = arith.constant 0.000000e+00 : f32
    %305 = vector.broadcast %cst_99 : f32 to vector<1x128xf32>
    %306 = arith.select %299, %304, %305 : vector<1x128xi1>, vector<1x128xf32>
    %307 = vector.broadcast %11 : vector<128x1xf32> to vector<128x128xf32>
    %308 = vector.broadcast %288 : vector<1x128xf32> to vector<128x128xf32>
    %309 = arith.subf %307, %308 : vector<128x128xf32>
    %310 = math.absf %309 : vector<128x128xf32>
    %cst_100 = arith.constant 1.000000e+00 : f32
    %311 = vector.broadcast %cst_100 : f32 to vector<128x128xf32>
    %312 = arith.subf %311, %310 : vector<128x128xf32>
    %cst_101 = arith.constant 0.000000e+00 : f32
    %313 = vector.broadcast %cst_101 : f32 to vector<128x128xf32>
    %314 = arith.maximumf %312, %313 : vector<128x128xf32>
    %315 = vector.broadcast %306 : vector<1x128xf32> to vector<128x128xf32>
    %316 = arith.mulf %314, %315 : vector<128x128xf32>
    %cst_102 = arith.constant dense<0.000000e+00> : vector<4x128xf32>
    %317 = tpu.matmul %1, %316, %cst_102 {dimension_numbers = #tpu.dot_dimension_numbers<[1], [0], [0], [1], [0, 0, 1, 1], [], []>} : vector<4x128xf32>, vector<128x128xf32>, vector<4x128xf32> -> vector<4x128xf32>
    %318 = tpu.concatenate %45, %79, %113, %147, %181, %215, %249, %283, %317 in 0 : vector<4x128xf32>, vector<4x128xf32>, vector<4x128xf32>, vector<4x128xf32>, vector<4x128xf32>, vector<4x128xf32>, vector<4x128xf32>, vector<4x128xf32>, vector<4x128xf32> -> vector<36x128xf32>
    %c0_103 = arith.constant 0 : index
    %c0_104 = arith.constant 0 : index
    %319 = vector.load %arg4[%c0_103, %c0_104] : memref<8x36xf32, #tpu.memory_space<vmem>>, vector<8x36xf32>
    %cst_105 = arith.constant dense<0.000000e+00> : vector<8x128xf32>
    %320 = tpu.matmul %319, %318, %cst_105 {dimension_numbers = #tpu.dot_dimension_numbers<[1], [0], [0], [1], [0, 0, 1, 1], [], []>} : vector<8x36xf32>, vector<36x128xf32>, vector<8x128xf32> -> vector<8x128xf32>
    %c0_106 = arith.constant 0 : index
    %c0_107 = arith.constant 0 : index
    %c0_108 = arith.constant 0 : index
    %321 = vector.load %arg5[%c0_106, %c0_107, %c0_108] : memref<1x8x128xf32, #tpu.memory_space<vmem>>, vector<1x8x128xf32>
    %322 = vector.shape_cast %321 : vector<1x8x128xf32> to vector<8x128xf32>
    %323 = vector.shape_cast %320 : vector<8x128xf32> to vector<1x8x128xf32>
    tpu.vector_store %arg5[%c0_106, %c0_107, %c0_108], %323 {strides = array<i32>} : memref<1x8x128xf32, #tpu.memory_space<vmem>>, vector<1x8x128xf32>,
    return
  }
  func.func @transform_0(%arg0: i32, %arg1: i32) -> (i32, i32, i32) {
    %c0_i32 = arith.constant 0 : i32
    %c0_i32_0 = arith.constant 0 : i32
    %c0_i32_1 = arith.constant 0 : i32
    return %arg0, %c0_i32, %c0_i32_0 : i32, i32, i32
  }
  func.func @transform_1(%arg0: i32, %arg1: i32) -> (i32, i32, i32) {
    %c0_i32 = arith.constant 0 : i32
    %c0_i32_0 = arith.constant 0 : i32
    return %arg0, %c0_i32, %arg1 : i32, i32, i32
  }
  func.func @transform_2(%arg0: i32, %arg1: i32) -> (i32, i32) {
    %c0_i32 = arith.constant 0 : i32
    %c0_i32_0 = arith.constant 0 : i32
    %c0_i32_1 = arith.constant 0 : i32
    return %c0_i32, %c0_i32_0 : i32, i32
  }
  func.func @transform_3(%arg0: i32, %arg1: i32) -> (i32, i32, i32) {
    %c0_i32 = arith.constant 0 : i32
    %c0_i32_0 = arith.constant 0 : i32
    return %arg0, %c0_i32, %arg1 : i32, i32, i32
  }
}

</mosaic_0001>

<bundles_post_ra>
// kernel: tpu_custom_call.1
= control target key start
LH: loop header
LB: loop body
LE: loop exit
PB: predicated region body
PF: predicated region fallthrough
CT: control target
= control target key end

     0   :  { %8 = vsyncpa [#allocation3], 0  ;;  %s3683_s0 = inlined_call_operand.vmem [shape: f32[2,4,128], index: 0, kind: input, shape index: {}]   ;;  %s3684_s1 = inlined_call_operand.vmem [shape: f32[2,18,128], index: 1, kind: input, shape index: {}]   ;;  %s3685_s2 = inlined_call_operand.vmem [shape: f32[8,36], index: 2, kind: input, shape index: {}]   ;;  %s3686_s3 = inlined_call_operand.hbm [shape: f32[2,8,128], index: 3, kind: output, shape index: {}]  }
   0x1   :  { %10 = vsyncpa [#allocation3 + $0x1], 0  ;;  %s2652_s12 = smov 0   ;;  %s2654_s13 = smov 0  }
   0x2   :  { %s2656_s14 = smov 0   ;;  %s2658_s15 = smov 0  }
   0x3   :  { %s2660_s16 = smov 0   ;;  %s2662_s17 = smov 0  }
   0x4 LB: > { %s1988_s18 = sadd.s32 4294967295, %s2626_s17   ;;  %s1989_s19 = sadd.s32 4294967294, %s2626_s17   ;;  %s2626_s17 = sphi %s2662_s17, %s16_s17   ;;  %s2622_s16 = sphi %s2660_s16, %s3717_s16   ;;  %s2618_s15 = sphi %s2658_s15, %s3716_s15   ;;  %s2614_s14 = sphi %s2656_s14, %s3715_s14   ;;  %s2610_s13 = sphi %s2654_s13, %s3714_s13   ;;  %s2606_s12 = sphi %s2652_s12, %s3713_s12  }
   0x5   : > { %s28_s20 = sadd.s32 1, %s2622_s16  ;;  %s112_s21 = sadd.s32 1, %s2614_s14 }
   0x6   : > { %p30_p0 = scmp.ge.s32.totalorder %s28_s20, 2  ;;  %p122_p1 = scmp.ne.s32.totalorder %s2614_s14, %s2610_s13 }
   0x7   : > { %p123_p2 = scmp.eq.s32.totalorder %s1988_s18, 1  ;;  %p128_p3 = scmp.ne.s32.totalorder %s2610_s13, %s2606_s12 }
   0x8   : > { %s3719_s20 = smov (%p30_p0, %s28_s20), 0  ;;  %p129_p5 = scmp.eq.s32.totalorder %s1989_s19, 1 }
   0x9   : > { %p2692_p4 = por %p123_p2, %p122_p1  ;;  %s107_s23 = ssub.s32 %s2622_s16, %s3719_s20 }
   0xa   : > { %p1992_p6 = scmp.ge.s32.totalorder %s2626_s17, 1  ;;  %p110_p7 = scmp.eq.s32.totalorder %s107_s23, 0 }
   0xb   : > { %p2699_p8 = por %p129_p5, %p128_p3  ;;  %p168_p9 = scmp.lt.s32.totalorder %s2626_s17, 3 }
   0xc   : > { %s2705_s25 = scalar_select %p110_p7, %s2614_s14, %s112_s21  }
   0xd   : > { %p169_p10 = pnand %p1992_p6, %p168_p9 }
   0xe   : > { %p199_p11 = scmp.lt.s32.totalorder (!%p169_p10), %s2618_s15, 1  ;;  %s196_s10 = sand.u32 (!%p169_p10), 1, %s2610_s13  }
   0xf   : > { %172 = sbr.rel (%p169_p10) target bundleno = 667 (0x29b), region = 32  ;;  %s1993_s11 = sshll.u32 (!%p169_p10), %s196_s10, 3 }
  0x10   : > { %s198_s18 = scalar_lea.vmem (!%p169_p10), [#allocation2], %s1993_s11  ;;  %s1999_s21 = sshll.u32 (!%p169_p10), %s2618_s15, 7 }
  0x11   : > { %s1902_s19 = sshll.u32 (!%p169_p10), %s198_s18, 4  ;;  %s1888_s28 = scalar_lea.sflag (!%p169_p10), [#allocation3], %s196_s10  ;;  %s3634_s19 = int_to_ptr.vmem [resolvable:$true] %s1902_s19 }
  0x12   : > { %s2550_s29 = scalar_lea.vmem (!%p169_p10), %s3634_s19, 128 }
  0x13   : > { %p2551_p12 = scmp.ne.s32.totalorder (!%p169_p10), %s3634_s19, %s2550_s29 }
  0x14   : > { %v217_v0 = vlaneseq  ;;  %v2628_v1 = vmov 0.0   ;;  %s2711_s26 = scalar_select %p199_p11, %s2618_s15, 1  ;;  %vm2629_vm0 = vmmov 0   ;;  %v2630_v23 = vmov 0  }
  0x15   : > { %2161 = vmatprep.subr.mxu0 %v2628_v1  ;;  %2196 = vmatprep.subr.mxu1 %v2628_v1  ;;  %p2552_p13 = pnand %p2551_p12, %p2692_p4  ;;  %s2631_s15 = smov [#allocation2]  }
  0x16   : > { %v218_v2 = vand.u32 127, %v217_v0  ;;  %v2713_v3 = vshrl.u32 %v217_v0, 7  ;;  %2193 = vmatprep.mubr.msk.f32.mxu0 %vm2629_vm0, %v2628_v1  ;;  %2228 = vmatprep.mubr.msk.f32.mxu1 %vm2629_vm0, %v2628_v1  ;;  %s2489_s27 = smul.u32 24, %s2711_s26  ;;  %s1994_s4 = sshll.u32 %s2711_s26, 2 }
  0x17   : > { %s2990_s7 = scalar_lea.vmem %s3683_s0, %s1994_s4  ;;  %p2553_p0 = pneg %p2552_p13 }
  0x18   : > { %v2720_v4 = vcvt.s32.f32 %v218_v2  ;;  %v238_v5 = vadd.s32 120, %v2713_v3  ;;  %v2724_v6 = vsub.s32 0, %v2713_v3  ;;  %v2727_v7 = vsub.s32 2, %v2713_v3  ;;  %s2736_s30 = scalar_lea.vmem %s3684_s1, %s2489_s27  ;;  %s3639_s27 = scalar_lea.hbm %s3686_s3, %s1999_s21 }
  0x19   : > { %v237_v8 = vadd.s32 112, %v2713_v3  ;;  %v236_v9 = vadd.s32 104, %v2713_v3  ;;  %v235_v10 = vadd.s32 96, %v2713_v3  ;;  %v234_v11 = vadd.s32 88, %v2713_v3  ;;  %v2744_v16 = vld [vmem:[%s2736_s30] sm:$0xff] }
  0x1a   : > { %v2738_v12 = vcvt.s32.f32 %v238_v5  ;;  %v255_v13 = vadd.f32 -4.0, %v2720_v4  ;;  %v435_v14 = vadd.f32 -3.0, %v2720_v4  ;;  %v233_v15 = vadd.s32 80, %v2713_v3 }
  0x1b   : > { %v2746_v17 = vcvt.s32.f32 %v237_v8  ;;  %v2748_v18 = vcvt.s32.f32 %v236_v9  ;;  %v2750_v19 = vcvt.s32.f32 %v235_v10  ;;  %v2752_v20 = vcvt.s32.f32 %v234_v11 }
  0x1c   : > { %v256_v21 = vadd.f32 %v255_v13, %v2744_v16  ;;  %vm260_vm1 = vcmp.gt.f32.partialorder %v2744_v16, -1.0  ;;  %vm265_vm2 = vcmp.lt.f32.partialorder %v2744_v16, 1.0  ;;  %v270_v22 = vand.u32 2147483647, %v2744_v16 }
  0x1d   : > { %v261_v24 = vsel %vm260_vm1, 1, %v2630_v23  ;;  %v266_v25 = vsel %vm265_vm2, 1, %v2630_v23  ;;  %v436_v26 = vadd.f32 %v435_v14, %v2744_v16  ;;  %v2761_v27 = vcvt.s32.f32 %v233_v15 }
  0x1e   : > { %vm257_vm3 = vcmp.gt.f32.partialorder %v256_v21, -1.0  ;;  %vm258_vm4 = vcmp.lt.f32.partialorder %v256_v21, 16.0  ;;  %v262_v28 = vrot.slane %v261_v24, 1  ;;  %v267_v29 = vrot.slane %v266_v25, 1 }
  0x1f   : > { %vm2763_vm5 = vmand %vm257_vm3, %vm258_vm4  ;;  %v271_v31 = vsub.f32 1.0, %v270_v22  ;;  %v2768_v32 = vrot.slane %v256_v21, %v2724_v6  ;;  %vm437_vm6 = vcmp.gt.f32.partialorder %v436_v26, -1.0  ;;  %vm438_vm7 = vcmp.lt.f32.partialorder %v436_v26, 16.0 }
  0x20   : > { %vm2770_vm8 = vcmp.ne.s32.totalorder %v262_v28, 0  ;;  %vm2774_vm9 = vcmp.ne.s32.totalorder %v267_v29, 0  ;;  %vm2778_vm10 = vmand %vm437_vm6, %vm438_vm7  ;;  %v2783_v36 = vrot.slane %v436_v26, %v2727_v7  ;;  %v232_v37 = vadd.s32 72, %v2713_v3 }
  0x21   : > { %vm264_vm11 = vmand %vm2763_vm5, %vm2770_vm8  ;;  %v272_v38 = vmax.f32 %v271_v31, 0.0  ;;  %v296_v39 = vsub.f32 %v2738_v12, %v2768_v32  ;;  %v295_v40 = vsub.f32 %v2746_v17, %v2768_v32  ;;  %v294_v41 = vsub.f32 %v2748_v18, %v2768_v32 }
  0x22   : > { %vm2798_vm12 = vmand %vm264_vm11, %vm2774_vm9  ;;  %v462_v43 = vsub.f32 %v2738_v12, %v2783_v36  ;;  %v461_v44 = vsub.f32 %v2746_v17, %v2783_v36  ;;  %v460_v45 = vsub.f32 %v2748_v18, %v2783_v36  ;;  %v293_v46 = vsub.f32 %v2750_v19, %v2768_v32 }
  0x23   : > { %v2810_v47 = vrot.slane %v272_v38, 1  ;;  %v312_v48 = vand.u32 2147483647, %v296_v39  ;;  %vm440_vm13 = vmand %vm2778_vm10, %vm2770_vm8  ;;  %v311_v49 = vand.u32 2147483647, %v295_v40  ;;  %v459_v50 = vsub.f32 %v2750_v19, %v2783_v36 }
  0x24   : > { %vm441_vm14 = vmand %vm440_vm13, %vm2774_vm9  ;;  %v478_v51 = vand.u32 2147483647, %v462_v43  ;;  %v477_v52 = vand.u32 2147483647, %v461_v44  ;;  %v310_v53 = vand.u32 2147483647, %v294_v41  ;;  %v292_v54 = vsub.f32 %v2752_v20, %v2768_v32 }
  0x25   : > { %v276_v55 = vsel %vm2798_vm12, %v2810_v47, 0.0  ;;  %v328_v56 = vsub.f32 1.0, %v312_v48  ;;  %v442_v57 = vsel %vm441_vm14, %v2810_v47, 0.0  ;;  %v327_v58 = vsub.f32 1.0, %v311_v49 }
  0x26   : > { %v2827_v59 = vrot.slane %v276_v55, %v2724_v6  ;;  %v494_v60 = vsub.f32 1.0, %v478_v51  ;;  %v2830_v61 = vrot.slane %v442_v57, %v2727_v7  ;;  %v493_v62 = vsub.f32 1.0, %v477_v52 }
  0x27   : > { %v344_v63 = vmax.f32 %v328_v56, 0.0  ;;  %v343_v0 = vmax.f32 %v327_v58, 0.0  ;;  %v326_v2 = vsub.f32 1.0, %v310_v53  ;;  %v476_v5 = vand.u32 2147483647, %v460_v45 }
  0x28   : > { %v510_v8 = vmax.f32 %v494_v60, 0.0  ;;  %v509_v9 = vmax.f32 %v493_v62, 0.0  ;;  %v309_v10 = vand.u32 2147483647, %v293_v46  ;;  %v475_v11 = vand.u32 2147483647, %v459_v50 }
  0x29   : > { %v364_v13 = vmul.f32 %v2827_v59, %v344_v63  ;;  %v363_v14 = vmul.f32 %v2827_v59, %v343_v0  ;;  %v342_v15 = vmax.f32 %v326_v2, 0.0  ;;  %v492_v21 = vsub.f32 1.0, %v476_v5 }
  0x2a   : > { %v530_v22 = vmul.f32 %v2830_v61, %v510_v8  ;;  %v529_v24 = vmul.f32 %v2830_v61, %v509_v9  ;;  %v325_v25 = vsub.f32 1.0, %v309_v10  ;;  %v491_v26 = vsub.f32 1.0, %v475_v11 }
  0x2b   : > { %2162 = vmatpush3.msra.mxu0 %v364_v13  ;;  %v362_v28 = vmul.f32 %v2827_v59, %v342_v15  ;;  %v508_v29 = vmax.f32 %v492_v21, 0.0  ;;  %v308_v30 = vand.u32 2147483647, %v292_v54  ;;  %v458_v31 = vsub.f32 %v2752_v20, %v2783_v36 }
  0x2c   : > { %2197 = vmatpush3.msra.mxu1 %v530_v22  ;;  %2163 = vmatprep.subr.mxu0 %v2628_v1  ;;  %v341_v35 = vmax.f32 %v325_v25, 0.0  ;;  %v507_v38 = vmax.f32 %v491_v26, 0.0  ;;  %v291_v39 = vsub.f32 %v2761_v27, %v2768_v32  ;;  %v457_v40 = vsub.f32 %v2761_v27, %v2783_v36 }
  0x2d   : > { %2198 = vmatprep.subr.mxu1 %v2628_v1  ;;  %2164 = vmatpush3.msra.mxu0 %v363_v14  ;;  %v528_v41 = vmul.f32 %v2830_v61, %v508_v29  ;;  %v324_v42 = vsub.f32 1.0, %v308_v30  ;;  %v474_v43 = vand.u32 2147483647, %v458_v31  ;;  %v2846_v44 = vcvt.s32.f32 %v232_v37 }
  0x2e   : > { %2199 = vmatpush3.msra.mxu1 %v529_v24  ;;  %2165 = vmatprep.subr.mxu0 %v2628_v1  ;;  %v361_v45 = vmul.f32 %v2827_v59, %v341_v35  ;;  %v527_v46 = vmul.f32 %v2830_v61, %v507_v38  ;;  %v307_v48 = vand.u32 2147483647, %v291_v39  ;;  %v473_v49 = vand.u32 2147483647, %v457_v40 }
  0x2f   : > { %2200 = vmatprep.subr.mxu1 %v2628_v1  ;;  %2166 = vmatpush3.msra.mxu0 %v362_v28  ;;  %v340_v50 = vmax.f32 %v324_v42, 0.0  ;;  %v490_v51 = vsub.f32 1.0, %v474_v43  ;;  %v290_v52 = vsub.f32 %v2846_v44, %v2768_v32  ;;  %v456_v37 = vsub.f32 %v2846_v44, %v2783_v36 }
  0x30   : > { %2201 = vmatpush3.msra.mxu1 %v528_v41  ;;  %2167 = vmatprep.subr.mxu0 %v2628_v1  ;;  %v323_v53 = vsub.f32 1.0, %v307_v48  ;;  %v489_v54 = vsub.f32 1.0, %v473_v49  ;;  %v231_v55 = vadd.s32 64, %v2713_v3  ;;  %v230_v56 = vadd.s32 56, %v2713_v3 }
  0x31   : > { %2202 = vmatprep.subr.mxu1 %v2628_v1  ;;  %2168 = vmatpush3.msra.mxu0 %v361_v45  ;;  %v360_v57 = vmul.f32 %v2827_v59, %v340_v50  ;;  %v506_v58 = vmax.f32 %v490_v51, 0.0  ;;  %v306_v60 = vand.u32 2147483647, %v290_v52  ;;  %v472_v62 = vand.u32 2147483647, %v456_v37 }
  0x32   : > { %2203 = vmatpush3.msra.mxu1 %v527_v46  ;;  %2169 = vmatprep.subr.mxu0 %v2628_v1  ;;  %v339_v63 = vmax.f32 %v323_v53, 0.0  ;;  %v505_v0 = vmax.f32 %v489_v54, 0.0  ;;  %v2862_v2 = vcvt.s32.f32 %v231_v55  ;;  %v2864_v5 = vcvt.s32.f32 %v230_v56 }
  0x33   : > { %2204 = vmatprep.subr.mxu1 %v2628_v1  ;;  %2170 = vmatpush3.msra.mxu0 %v360_v57  ;;  %v526_v8 = vmul.f32 %v2830_v61, %v506_v58  ;;  %v322_v9 = vsub.f32 1.0, %v306_v60  ;;  %v488_v10 = vsub.f32 1.0, %v472_v62  ;;  %v229_v11 = vadd.s32 48, %v2713_v3 }
  0x34   : > { %2171 = vmatprep.subr.mxu0 %v2628_v1  ;;  %v359_v13 = vmul.f32 %v2827_v59, %v339_v63  ;;  %v525_v14 = vmul.f32 %v2830_v61, %v505_v0  ;;  %v289_v15 = vsub.f32 %v2862_v2, %v2768_v32  ;;  %v455_v21 = vsub.f32 %v2862_v2, %v2783_v36 }
  0x35   : > { %2205 = vmatpush3.msra.mxu1 %v526_v8  ;;  %v338_v22 = vmax.f32 %v322_v9, 0.0  ;;  %v504_v24 = vmax.f32 %v488_v10, 0.0  ;;  %v288_v25 = vsub.f32 %v2864_v5, %v2768_v32  ;;  %v454_v26 = vsub.f32 %v2864_v5, %v2783_v36 }
  0x36   : > { %2206 = vmatprep.subr.mxu1 %v2628_v1  ;;  %2172 = vmatpush3.msra.mxu0 %v359_v13  ;;  %v305_v28 = vand.u32 2147483647, %v289_v15  ;;  %v471_v29 = vand.u32 2147483647, %v455_v21  ;;  %v2881_v30 = vcvt.s32.f32 %v229_v11  ;;  %v228_v31 = vadd.s32 40, %v2713_v3 }
  0x37   : > { %2207 = vmatpush3.msra.mxu1 %v525_v14  ;;  %2173 = vmatprep.subr.mxu0 %v2628_v1  ;;  %v358_v35 = vmul.f32 %v2827_v59, %v338_v22  ;;  %v524_v38 = vmul.f32 %v2830_v61, %v504_v24  ;;  %v304_v39 = vand.u32 2147483647, %v288_v25  ;;  %v470_v40 = vand.u32 2147483647, %v454_v26 }
  0x38   : > { %2208 = vmatprep.subr.mxu1 %v2628_v1  ;;  %v321_v41 = vsub.f32 1.0, %v305_v28  ;;  %v487_v42 = vsub.f32 1.0, %v471_v29  ;;  %v287_v43 = vsub.f32 %v2881_v30, %v2768_v32  ;;  %v453_v45 = vsub.f32 %v2881_v30, %v2783_v36 }
  0x39   : > { %2174 = vmatpush3.msra.mxu0 %v358_v35  ;;  %2209 = vmatpush3.msra.mxu1 %v524_v38  ;;  %v320_v46 = vsub.f32 1.0, %v304_v39  ;;  %v486_v48 = vsub.f32 1.0, %v470_v40  ;;  %v2892_v49 = vcvt.s32.f32 %v228_v31  ;;  %v227_v50 = vadd.s32 32, %v2713_v3 }
  0x3a   : > { %2175 = vmatprep.subr.mxu0 %v2628_v1  ;;  %2210 = vmatprep.subr.mxu1 %v2628_v1  ;;  %v337_v51 = vmax.f32 %v321_v41, 0.0  ;;  %v503_v52 = vmax.f32 %v487_v42, 0.0  ;;  %v303_v37 = vand.u32 2147483647, %v287_v43  ;;  %v469_v53 = vand.u32 2147483647, %v453_v45 }
  0x3b   : > { %v336_v54 = vmax.f32 %v320_v46, 0.0  ;;  %v502_v55 = vmax.f32 %v486_v48, 0.0  ;;  %v286_v56 = vsub.f32 %v2892_v49, %v2768_v32  ;;  %v452_v57 = vsub.f32 %v2892_v49, %v2783_v36 }
  0x3c   : > { %v357_v58 = vmul.f32 %v2827_v59, %v337_v51  ;;  %v523_v60 = vmul.f32 %v2830_v61, %v503_v52  ;;  %v319_v62 = vsub.f32 1.0, %v303_v37  ;;  %v485_v63 = vsub.f32 1.0, %v469_v53 }
  0x3d   : > { %v356_v0 = vmul.f32 %v2827_v59, %v336_v54  ;;  %v522_v8 = vmul.f32 %v2830_v61, %v502_v55  ;;  %v302_v9 = vand.u32 2147483647, %v286_v56  ;;  %v468_v10 = vand.u32 2147483647, %v452_v57 }
  0x3e   : > { %2176 = vmatpush3.msra.mxu0 %v357_v58  ;;  %2211 = vmatpush3.msra.mxu1 %v523_v60  ;;  %v335_v11 = vmax.f32 %v319_v62, 0.0  ;;  %v501_v13 = vmax.f32 %v485_v63, 0.0  ;;  %v2905_v14 = vcvt.s32.f32 %v227_v50  ;;  %v226_v15 = vadd.s32 24, %v2713_v3 }
  0x3f   : > { %2177 = vmatprep.subr.mxu0 %v2628_v1  ;;  %2212 = vmatprep.subr.mxu1 %v2628_v1  ;;  %v318_v21 = vsub.f32 1.0, %v302_v9  ;;  %v484_v22 = vsub.f32 1.0, %v468_v10  ;;  %v225_v24 = vadd.s32 16, %v2713_v3  ;;  %v224_v25 = vadd.s32 8, %v2713_v3 }
  0x40   : > { %2178 = vmatpush3.msra.mxu0 %v356_v0  ;;  %2213 = vmatpush3.msra.mxu1 %v522_v8  ;;  %v355_v26 = vmul.f32 %v2827_v59, %v335_v11  ;;  %v521_v28 = vmul.f32 %v2830_v61, %v501_v13  ;;  %v285_v29 = vsub.f32 %v2905_v14, %v2768_v32  ;;  %v2916_v31 = vcvt.s32.f32 %v226_v15 }
  0x41   : > { %2179 = vmatprep.subr.mxu0 %v2628_v1  ;;  %2214 = vmatprep.subr.mxu1 %v2628_v1  ;;  %v334_v35 = vmax.f32 %v318_v21, 0.0  ;;  %v500_v38 = vmax.f32 %v484_v22, 0.0  ;;  %v451_v39 = vsub.f32 %v2905_v14, %v2783_v36  ;;  %v2922_v40 = vcvt.s32.f32 %v225_v24 }
  0x42   : > { %2180 = vmatpush3.msra.mxu0 %v355_v26  ;;  %2215 = vmatpush3.msra.mxu1 %v521_v28  ;;  %v301_v41 = vand.u32 2147483647, %v285_v29  ;;  %v284_v42 = vsub.f32 %v2916_v31, %v2768_v32  ;;  %v450_v43 = vsub.f32 %v2916_v31, %v2783_v36  ;;  %v2928_v45 = vcvt.s32.f32 %v224_v25 }
  0x43   : > { %2181 = vmatprep.subr.mxu0 %v2628_v1  ;;  %2216 = vmatprep.subr.mxu1 %v2628_v1  ;;  %v354_v46 = vmul.f32 %v2827_v59, %v334_v35  ;;  %v520_v48 = vmul.f32 %v2830_v61, %v500_v38  ;;  %v467_v50 = vand.u32 2147483647, %v451_v39  ;;  %v283_v51 = vsub.f32 %v2922_v40, %v2768_v32 }
  0x44   : > { %v317_v52 = vsub.f32 1.0, %v301_v41  ;;  %v300_v37 = vand.u32 2147483647, %v284_v42  ;;  %v466_v53 = vand.u32 2147483647, %v450_v43  ;;  %v449_v54 = vsub.f32 %v2922_v40, %v2783_v36 }
  0x45   : > { %2182 = vmatpush3.msra.mxu0 %v354_v46  ;;  %2217 = vmatpush3.msra.mxu1 %v520_v48  ;;  %v483_v55 = vsub.f32 1.0, %v467_v50  ;;  %v299_v56 = vand.u32 2147483647, %v283_v51  ;;  %v282_v57 = vsub.f32 %v2928_v45, %v2768_v32  ;;  %v448_v58 = vsub.f32 %v2928_v45, %v2783_v36 }
  0x46   : > { %2183 = vmatprep.subr.mxu0 %v2628_v1  ;;  %2218 = vmatprep.subr.mxu1 %v2628_v1  ;;  %v333_v60 = vmax.f32 %v317_v52, 0.0  ;;  %v316_v62 = vsub.f32 1.0, %v300_v37  ;;  %v482_v63 = vsub.f32 1.0, %v466_v53  ;;  %v465_v0 = vand.u32 2147483647, %v449_v54  ;;  %v2964_v37 = vld [vmem:[%s2736_s30 + $0x8] sm:$0xff] }
  0x47   : > { %v499_v8 = vmax.f32 %v483_v55, 0.0  ;;  %v315_v9 = vsub.f32 1.0, %v299_v56  ;;  %v298_v10 = vand.u32 2147483647, %v282_v57  ;;  %v464_v11 = vand.u32 2147483647, %v448_v58 }
  0x48   : > { %v353_v13 = vmul.f32 %v2827_v59, %v333_v60  ;;  %v332_v15 = vmax.f32 %v316_v62, 0.0  ;;  %v498_v21 = vmax.f32 %v482_v63, 0.0  ;;  %v481_v22 = vsub.f32 1.0, %v465_v0 }
  0x49   : > { %v519_v24 = vmul.f32 %v2830_v61, %v499_v8  ;;  %v331_v25 = vmax.f32 %v315_v9, 0.0  ;;  %v314_v26 = vsub.f32 1.0, %v298_v10  ;;  %v480_v28 = vsub.f32 1.0, %v464_v11 }
  0x4a   : > { %2184 = vmatpush3.msra.mxu0 %v353_v13  ;;  %v352_v29 = vmul.f32 %v2827_v59, %v332_v15  ;;  %v518_v35 = vmul.f32 %v2830_v61, %v498_v21  ;;  %v497_v38 = vmax.f32 %v481_v22, 0.0  ;;  %v2949_v39 = vcvt.s32.f32 %v2713_v3 }
  0x4b   : > { %2219 = vmatpush3.msra.mxu1 %v519_v24  ;;  %2185 = vmatprep.subr.mxu0 %v2628_v1  ;;  %v351_v41 = vmul.f32 %v2827_v59, %v331_v25  ;;  %v330_v42 = vmax.f32 %v314_v26, 0.0  ;;  %v496_v43 = vmax.f32 %v480_v28, 0.0  ;;  %v601_v46 = vadd.f32 -2.0, %v2720_v4  ;;  %v3014_v26 = vld [vmem:[%s2990_s7] sm:$0xf] }
  0x4c   : > { %2220 = vmatprep.subr.mxu1 %v2628_v1  ;;  %2186 = vmatpush3.msra.mxu0 %v352_v29  ;;  %v517_v48 = vmul.f32 %v2830_v61, %v497_v38  ;;  %v281_v50 = vsub.f32 %v2949_v39, %v2768_v32  ;;  %v447_v51 = vsub.f32 %v2949_v39, %v2783_v36  ;;  %v2961_v52 = vsub.s32 4, %v2713_v3 }
  0x4d   : > { %2221 = vmatpush3.msra.mxu1 %v518_v35  ;;  %2187 = vmatprep.subr.mxu0 %v2628_v1  ;;  %v350_v53 = vmul.f32 %v2827_v59, %v330_v42  ;;  %v516_v54 = vmul.f32 %v2830_v61, %v496_v43  ;;  %v602_v55 = vadd.f32 %v601_v46, %v2744_v16  ;;  %v767_v56 = vadd.f32 -1.0, %v2720_v4 }
  0x4e   : > { %2222 = vmatprep.subr.mxu1 %v2628_v1  ;;  %2188 = vmatpush3.msra.mxu0 %v351_v41  ;;  %v297_v32 = vand.u32 2147483647, %v281_v50  ;;  %v463_v36 = vand.u32 2147483647, %v447_v51  ;;  %v2974_v57 = vsub.s32 6, %v2713_v3  ;;  %v2984_v3 = vadd.f32 %v2720_v4, %v2964_v37 }
  0x4f   : > { %2223 = vmatpush3.msra.mxu1 %v517_v48  ;;  %2189 = vmatprep.subr.mxu0 %v2628_v1  ;;  %vm603_vm15 = vcmp.gt.f32.partialorder %v602_v55, -1.0  ;;  %vm604_vm1 = vcmp.lt.f32.partialorder %v602_v55, 16.0  ;;  %v2978_v58 = vrot.slane %v602_v55, %v2961_v52  ;;  %v768_v60 = vadd.f32 %v767_v56, %v2744_v16 }
  0x50   : > { %2224 = vmatprep.subr.mxu1 %v2628_v1  ;;  %2190 = vmatpush3.msra.mxu0 %v350_v53  ;;  %v313_v62 = vsub.f32 1.0, %v297_v32  ;;  %v479_v63 = vsub.f32 1.0, %v463_v36  ;;  %vm605_vm2 = vmand %vm603_vm15, %vm604_vm1  ;;  %vm938_vm12 = vcmp.gt.f32.partialorder %v2964_v37, -1.0  ;;  %vm943_vm14 = vcmp.lt.f32.partialorder %v2964_v37, 1.0 }
  0x51   : > { %2225 = vmatpush3.msra.mxu1 %v516_v54  ;;  %2191 = vmatprep.subr.mxu0 %v2628_v1  ;;  %vm606_vm3 = vmand %vm605_vm2, %vm2770_vm8  ;;  %v628_v16 = vsub.f32 %v2738_v12, %v2978_v58  ;;  %vm769_vm4 = vcmp.gt.f32.partialorder %v768_v60, -1.0  ;;  %vm770_vm5 = vcmp.lt.f32.partialorder %v768_v60, 16.0  ;;  %v2997_v0 = vrot.slane %v768_v60, %v2974_v57 }
  0x52   : > { %2226 = vmatprep.subr.mxu1 %v2628_v1  ;;  %v329_v8 = vmax.f32 %v313_v62, 0.0  ;;  %v495_v9 = vmax.f32 %v479_v63, 0.0  ;;  %vm607_vm6 = vmand %vm606_vm3, %vm2774_vm9  ;;  %v627_v10 = vsub.f32 %v2746_v17, %v2978_v58  ;;  %v626_v11 = vsub.f32 %v2748_v18, %v2978_v58 }
  0x53   : > { %v608_v13 = vsel %vm607_vm6, %v2810_v47, 0.0  ;;  %v644_v15 = vand.u32 2147483647, %v628_v16  ;;  %vm771_vm7 = vmand %vm769_vm4, %vm770_vm5  ;;  %v794_v21 = vsub.f32 %v2738_v12, %v2997_v0  ;;  %v793_v22 = vsub.f32 %v2746_v17, %v2997_v0 }
  0x54   : > { %v349_v24 = vmul.f32 %v2827_v59, %v329_v8  ;;  %v515_v25 = vmul.f32 %v2830_v61, %v495_v9  ;;  %v3017_v28 = vrot.slane %v608_v13, %v2961_v52  ;;  %vm772_vm10 = vmand %vm771_vm7, %vm2770_vm8  ;;  %v643_v29 = vand.u32 2147483647, %v627_v10 }
  0x55   : > { %v660_v35 = vsub.f32 1.0, %v644_v15  ;;  %vm773_vm11 = vmand %vm772_vm10, %vm2774_vm9  ;;  %v810_v38 = vand.u32 2147483647, %v794_v21  ;;  %v809_v41 = vand.u32 2147483647, %v793_v22  ;;  %v792_v59 = vsub.f32 %v2748_v18, %v2997_v0 }
  0x56   : > { %2192 = vmatpush3.msra.mxu0 %v349_v24  ;;  %2227 = vmatpush3.msra.mxu1 %v515_v25  ;;  %v774_v61 = vsel %vm773_vm11, %v2810_v47, 0.0  ;;  %v659_v42 = vsub.f32 1.0, %v643_v29  ;;  %v642_v43 = vand.u32 2147483647, %v626_v11  ;;  %v625_v33 = vsub.f32 %v2750_v19, %v2978_v58 }
  0x57   : > { %2194 = vmatmul.mubr.f32.vlgmr.msra.gmra.mxu0 %v3014_v26  ;;  %2229 = vmatmul.mubr.f32.vlgmr.msra.gmra.mxu1 %v3014_v26  ;;  %v676_v34 = vmax.f32 %v660_v35, 0.0  ;;  %v826_v46 = vsub.f32 1.0, %v810_v38  ;;  %v3031_v48 = vrot.slane %v774_v61, %v2974_v57  ;;  %v825_v50 = vsub.f32 1.0, %v809_v41 }
  0x58   : > { %2231 = vmatprep.subr.mxu0 %v2628_v1  ;;  %2266 = vmatprep.subr.mxu1 %v2628_v1  ;;  %v675_v47 = vmax.f32 %v659_v42, 0.0  ;;  %v658_v51 = vsub.f32 1.0, %v642_v43  ;;  %v808_v53 = vand.u32 2147483647, %v792_v59  ;;  %v641_v54 = vand.u32 2147483647, %v625_v33 }
  0x59   : > { %v696_v55 = vmul.f32 %v3017_v28, %v676_v34  ;;  %v842_v56 = vmax.f32 %v826_v46, 0.0  ;;  %v841_v32 = vmax.f32 %v825_v50, 0.0  ;;  %v791_v36 = vsub.f32 %v2750_v19, %v2997_v0  ;;  %2263 = vmatprep.mubr.msk.f32.mxu0 %vm2629_vm0, %v2628_v1  ;;  %2298 = vmatprep.mubr.msk.f32.mxu1 %vm2629_vm0, %v2628_v1 }
  0x5a   : > { %v695_v60 = vmul.f32 %v3017_v28, %v675_v47  ;;  %v674_v62 = vmax.f32 %v658_v51, 0.0  ;;  %v824_v63 = vsub.f32 1.0, %v808_v53  ;;  %v657_v16 = vsub.f32 1.0, %v641_v54 }
  0x5b   : > { %2232 = vmatpush3.msra.mxu0 %v696_v55  ;;  %v862_v8 = vmul.f32 %v3031_v48, %v842_v56  ;;  %v861_v9 = vmul.f32 %v3031_v48, %v841_v32  ;;  %v807_v10 = vand.u32 2147483647, %v791_v36  ;;  %v624_v11 = vsub.f32 %v2752_v20, %v2978_v58 }
  0x5c   : > { %2233 = vmatprep.subr.mxu0 %v2628_v1  ;;  %v694_v13 = vmul.f32 %v3017_v28, %v674_v62  ;;  %v840_v15 = vmax.f32 %v824_v63, 0.0  ;;  %v673_v21 = vmax.f32 %v657_v16, 0.0  ;;  %v790_v22 = vsub.f32 %v2752_v20, %v2997_v0 }
  0x5d   : > { %2267 = vmatpush3.msra.mxu1 %v862_v8  ;;  %2234 = vmatpush3.msra.mxu0 %v695_v60  ;;  %v823_v24 = vsub.f32 1.0, %v807_v10  ;;  %v640_v25 = vand.u32 2147483647, %v624_v11  ;;  %v623_v29 = vsub.f32 %v2761_v27, %v2978_v58  ;;  %v789_v35 = vsub.f32 %v2761_v27, %v2997_v0 }
  0x5e   : > { %2268 = vmatprep.subr.mxu1 %v2628_v1  ;;  %2235 = vmatprep.subr.mxu0 %v2628_v1  ;;  %v860_v38 = vmul.f32 %v3031_v48, %v840_v15  ;;  %v693_v41 = vmul.f32 %v3017_v28, %v673_v21  ;;  %v806_v59 = vand.u32 2147483647, %v790_v22  ;;  %v622_v61 = vsub.f32 %v2846_v44, %v2978_v58 }
  0x5f   : > { %2269 = vmatpush3.msra.mxu1 %v861_v9  ;;  %2236 = vmatpush3.msra.mxu0 %v694_v13  ;;  %v839_v42 = vmax.f32 %v823_v24, 0.0  ;;  %v656_v43 = vsub.f32 1.0, %v640_v25  ;;  %v639_v33 = vand.u32 2147483647, %v623_v29  ;;  %v805_v34 = vand.u32 2147483647, %v789_v35 }
  0x60   : > { %2270 = vmatprep.subr.mxu1 %v2628_v1  ;;  %2237 = vmatprep.subr.mxu0 %v2628_v1  ;;  %v822_v46 = vsub.f32 1.0, %v806_v59  ;;  %v638_v50 = vand.u32 2147483647, %v622_v61  ;;  %v788_v47 = vsub.f32 %v2846_v44, %v2997_v0  ;;  %v621_v51 = vsub.f32 %v2862_v2, %v2978_v58 }
  0x61   : > { %2271 = vmatpush3.msra.mxu1 %v860_v38  ;;  %2238 = vmatpush3.msra.mxu0 %v693_v41  ;;  %v859_v53 = vmul.f32 %v3031_v48, %v839_v42  ;;  %v672_v54 = vmax.f32 %v656_v43, 0.0  ;;  %v655_v55 = vsub.f32 1.0, %v639_v33  ;;  %v821_v56 = vsub.f32 1.0, %v805_v34 }
  0x62   : > { %2272 = vmatprep.subr.mxu1 %v2628_v1  ;;  %2239 = vmatprep.subr.mxu0 %v2628_v1  ;;  %v838_v32 = vmax.f32 %v822_v46, 0.0  ;;  %v654_v36 = vsub.f32 1.0, %v638_v50  ;;  %v804_v60 = vand.u32 2147483647, %v788_v47  ;;  %v637_v62 = vand.u32 2147483647, %v621_v51 }
  0x63   : > { %2273 = vmatpush3.msra.mxu1 %v859_v53  ;;  %v692_v63 = vmul.f32 %v3017_v28, %v672_v54  ;;  %v671_v16 = vmax.f32 %v655_v55, 0.0  ;;  %v837_v8 = vmax.f32 %v821_v56, 0.0  ;;  %v787_v9 = vsub.f32 %v2862_v2, %v2997_v0 }
  0x64   : > { %2274 = vmatprep.subr.mxu1 %v2628_v1  ;;  %v858_v10 = vmul.f32 %v3031_v48, %v838_v32  ;;  %v670_v11 = vmax.f32 %v654_v36, 0.0  ;;  %v820_v13 = vsub.f32 1.0, %v804_v60  ;;  %v653_v15 = vsub.f32 1.0, %v637_v62 }
  0x65   : > { %2240 = vmatpush3.msra.mxu0 %v692_v63  ;;  %v691_v21 = vmul.f32 %v3017_v28, %v671_v16  ;;  %v857_v22 = vmul.f32 %v3031_v48, %v837_v8  ;;  %v803_v24 = vand.u32 2147483647, %v787_v9  ;;  %v620_v25 = vsub.f32 %v2864_v5, %v2978_v58 }
  0x66   : > { %2275 = vmatpush3.msra.mxu1 %v858_v10  ;;  %2241 = vmatprep.subr.mxu0 %v2628_v1  ;;  %v690_v29 = vmul.f32 %v3017_v28, %v670_v11  ;;  %v836_v35 = vmax.f32 %v820_v13, 0.0  ;;  %v669_v38 = vmax.f32 %v653_v15, 0.0  ;;  %v786_v41 = vsub.f32 %v2864_v5, %v2997_v0 }
  0x67   : > { %2276 = vmatprep.subr.mxu1 %v2628_v1  ;;  %2242 = vmatpush3.msra.mxu0 %v691_v21  ;;  %v819_v59 = vsub.f32 1.0, %v803_v24  ;;  %v636_v61 = vand.u32 2147483647, %v620_v25  ;;  %v619_v42 = vsub.f32 %v2881_v30, %v2978_v58  ;;  %v785_v43 = vsub.f32 %v2881_v30, %v2997_v0 }
  0x68   : > { %2277 = vmatpush3.msra.mxu1 %v857_v22  ;;  %2243 = vmatprep.subr.mxu0 %v2628_v1  ;;  %v856_v33 = vmul.f32 %v3031_v48, %v836_v35  ;;  %v689_v34 = vmul.f32 %v3017_v28, %v669_v38  ;;  %v802_v46 = vand.u32 2147483647, %v786_v41  ;;  %v618_v50 = vsub.f32 %v2892_v49, %v2978_v58 }
  0x69   : > { %2278 = vmatprep.subr.mxu1 %v2628_v1  ;;  %2244 = vmatpush3.msra.mxu0 %v690_v29  ;;  %v835_v47 = vmax.f32 %v819_v59, 0.0  ;;  %v652_v51 = vsub.f32 1.0, %v636_v61  ;;  %v635_v53 = vand.u32 2147483647, %v619_v42  ;;  %v801_v54 = vand.u32 2147483647, %v785_v43 }
  0x6a   : > { %2279 = vmatpush3.msra.mxu1 %v856_v33  ;;  %2245 = vmatprep.subr.mxu0 %v2628_v1  ;;  %v818_v55 = vsub.f32 1.0, %v802_v46  ;;  %v634_v56 = vand.u32 2147483647, %v618_v50  ;;  %v784_v32 = vsub.f32 %v2892_v49, %v2997_v0  ;;  %v617_v36 = vsub.f32 %v2905_v14, %v2978_v58 }
  0x6b   : > { %2280 = vmatprep.subr.mxu1 %v2628_v1  ;;  %2246 = vmatpush3.msra.mxu0 %v689_v34  ;;  %v855_v60 = vmul.f32 %v3031_v48, %v835_v47  ;;  %v668_v62 = vmax.f32 %v652_v51, 0.0  ;;  %v651_v63 = vsub.f32 1.0, %v635_v53  ;;  %v817_v16 = vsub.f32 1.0, %v801_v54 }
  0x6c   : > { %2247 = vmatprep.subr.mxu0 %v2628_v1  ;;  %v834_v8 = vmax.f32 %v818_v55, 0.0  ;;  %v650_v9 = vsub.f32 1.0, %v634_v56  ;;  %v800_v10 = vand.u32 2147483647, %v784_v32  ;;  %v633_v11 = vand.u32 2147483647, %v617_v36 }
  0x6d   : > { %2281 = vmatpush3.msra.mxu1 %v855_v60  ;;  %v688_v13 = vmul.f32 %v3017_v28, %v668_v62  ;;  %v667_v15 = vmax.f32 %v651_v63, 0.0  ;;  %v833_v21 = vmax.f32 %v817_v16, 0.0  ;;  %v783_v22 = vsub.f32 %v2905_v14, %v2997_v0 }
  0x6e   : > { %2282 = vmatprep.subr.mxu1 %v2628_v1  ;;  %v854_v24 = vmul.f32 %v3031_v48, %v834_v8  ;;  %v666_v25 = vmax.f32 %v650_v9, 0.0  ;;  %v816_v29 = vsub.f32 1.0, %v800_v10  ;;  %v649_v35 = vsub.f32 1.0, %v633_v11 }
  0x6f   : > { %2248 = vmatpush3.msra.mxu0 %v688_v13  ;;  %v687_v38 = vmul.f32 %v3017_v28, %v667_v15  ;;  %v853_v41 = vmul.f32 %v3031_v48, %v833_v21  ;;  %v799_v59 = vand.u32 2147483647, %v783_v22  ;;  %v616_v61 = vsub.f32 %v2916_v31, %v2978_v58 }
  0x70   : > { %2283 = vmatpush3.msra.mxu1 %v854_v24  ;;  %2249 = vmatprep.subr.mxu0 %v2628_v1  ;;  %v686_v42 = vmul.f32 %v3017_v28, %v666_v25  ;;  %v832_v43 = vmax.f32 %v816_v29, 0.0  ;;  %v665_v33 = vmax.f32 %v649_v35, 0.0  ;;  %v782_v34 = vsub.f32 %v2916_v31, %v2997_v0 }
  0x71   : > { %vm935_vm8 = vcmp.gt.f32.partialorder %v2984_v3, -1.0  ;;  %vm936_vm9 = vcmp.lt.f32.partialorder %v2984_v3, 16.0  ;;  %2284 = vmatprep.subr.mxu1 %v2628_v1  ;;  %2250 = vmatpush3.msra.mxu0 %v687_v38  ;;  %v815_v46 = vsub.f32 1.0, %v799_v59  ;;  %v632_v50 = vand.u32 2147483647, %v616_v61 }
  0x72   : > { %v615_v47 = vsub.f32 %v2922_v40, %v2978_v58  ;;  %v781_v51 = vsub.f32 %v2922_v40, %v2997_v0  ;;  %2285 = vmatpush3.msra.mxu1 %v853_v41  ;;  %2251 = vmatprep.subr.mxu0 %v2628_v1  ;;  %v852_v53 = vmul.f32 %v3031_v48, %v832_v43  ;;  %v798_v55 = vand.u32 2147483647, %v782_v34  ;;  %vm3152_vm13 = vmand %vm935_vm8, %vm936_vm9 }
  0x73   : > { %v685_v54 = vmul.f32 %v3017_v28, %v665_v33  ;;  %v614_v56 = vsub.f32 %v2928_v45, %v2978_v58  ;;  %2286 = vmatprep.subr.mxu1 %v2628_v1  ;;  %2252 = vmatpush3.msra.mxu0 %v686_v42  ;;  %v831_v32 = vmax.f32 %v815_v46, 0.0  ;;  %v648_v36 = vsub.f32 1.0, %v632_v50 }
  0x74   : > { %v631_v60 = vand.u32 2147483647, %v615_v47  ;;  %v797_v62 = vand.u32 2147483647, %v781_v51  ;;  %2287 = vmatpush3.msra.mxu1 %v852_v53  ;;  %2253 = vmatprep.subr.mxu0 %v2628_v1  ;;  %v814_v63 = vsub.f32 1.0, %v798_v55  ;;  %v780_v8 = vsub.f32 %v2928_v45, %v2997_v0 }
  0x75   : > { %v630_v16 = vand.u32 2147483647, %v614_v56  ;;  %v613_v9 = vsub.f32 %v2949_v39, %v2978_v58  ;;  %2288 = vmatprep.subr.mxu1 %v2628_v1  ;;  %2254 = vmatpush3.msra.mxu0 %v685_v54  ;;  %v851_v10 = vmul.f32 %v3031_v48, %v831_v32  ;;  %v664_v11 = vmax.f32 %v648_v36, 0.0 }
  0x76   : > { %v647_v13 = vsub.f32 1.0, %v631_v60  ;;  %v813_v15 = vsub.f32 1.0, %v797_v62  ;;  %2255 = vmatprep.subr.mxu0 %v2628_v1  ;;  %v830_v21 = vmax.f32 %v814_v63, 0.0  ;;  %v796_v24 = vand.u32 2147483647, %v780_v8 }
  0x77   : > { %v646_v22 = vsub.f32 1.0, %v630_v16  ;;  %v629_v25 = vand.u32 2147483647, %v613_v9  ;;  %2289 = vmatpush3.msra.mxu1 %v851_v10  ;;  %v684_v29 = vmul.f32 %v3017_v28, %v664_v11  ;;  %v779_v58 = vsub.f32 %v2949_v39, %v2997_v0 }
  0x78   : > { %v663_v35 = vmax.f32 %v647_v13, 0.0  ;;  %v829_v38 = vmax.f32 %v813_v15, 0.0  ;;  %2290 = vmatprep.subr.mxu1 %v2628_v1  ;;  %v850_v41 = vmul.f32 %v3031_v48, %v830_v21  ;;  %v812_v61 = vsub.f32 1.0, %v796_v24 }
  0x79   : > { %v662_v59 = vmax.f32 %v646_v22, 0.0  ;;  %v645_v42 = vsub.f32 1.0, %v629_v25  ;;  %2256 = vmatpush3.msra.mxu0 %v684_v29  ;;  %v795_v34 = vand.u32 2147483647, %v779_v58  ;;  %v939_v47 = vsel %vm938_vm12, 1, %v2630_v23 }
  0x7a   : > { %v683_v43 = vmul.f32 %v3017_v28, %v663_v35  ;;  %v849_v33 = vmul.f32 %v3031_v48, %v829_v38  ;;  %2291 = vmatpush3.msra.mxu1 %v850_v41  ;;  %2257 = vmatprep.subr.mxu0 %v2628_v1  ;;  %v828_v46 = vmax.f32 %v812_v61, 0.0  ;;  %v940_v54 = vrot.slane %v939_v47, 1 }
  0x7b   : > { %v682_v0 = vmul.f32 %v3017_v28, %v662_v59  ;;  %v661_v50 = vmax.f32 %v645_v42, 0.0  ;;  %2292 = vmatprep.subr.mxu1 %v2628_v1  ;;  %v811_v51 = vsub.f32 1.0, %v795_v34  ;;  %v948_v55 = vand.u32 2147483647, %v2964_v37 }
  0x7c   : > { %2258 = vmatpush3.msra.mxu0 %v683_v43  ;;  %2293 = vmatpush3.msra.mxu1 %v849_v33  ;;  %v848_v56 = vmul.f32 %v3031_v48, %v828_v46  ;;  %v944_v36 = vsel %vm943_vm14, 1, %v2630_v23  ;;  %v3164_v60 = vrot.slane %v2984_v3, %v2724_v6  ;;  %vm3167_vm15 = vcmp.ne.s32.totalorder %v940_v54, 0 }
  0x7d   : > { %2259 = vmatprep.subr.mxu0 %v2628_v1  ;;  %v681_v32 = vmul.f32 %v3017_v28, %v661_v50  ;;  %2294 = vmatprep.subr.mxu1 %v2628_v1  ;;  %v827_v62 = vmax.f32 %v811_v51, 0.0  ;;  %v945_v16 = vrot.slane %v944_v36, 1  ;;  %v949_v8 = vsub.f32 1.0, %v948_v55  ;;  %vm942_vm1 = vmand %vm3152_vm13, %vm3167_vm15 }
  0x7e   : > { %2260 = vmatpush3.msra.mxu0 %v682_v0  ;;  %2295 = vmatpush3.msra.mxu1 %v848_v56  ;;  %v974_v3 = vsub.f32 %v2738_v12, %v3164_v60  ;;  %v1113_v28 = vadd.f32 1.0, %v2720_v4  ;;  %v973_v9 = vsub.f32 %v2746_v17, %v3164_v60  ;;  %v972_v10 = vsub.f32 %v2748_v18, %v3164_v60 }
  0x7f   : > { %2261 = vmatprep.subr.mxu0 %v2628_v1  ;;  %2296 = vmatprep.subr.mxu1 %v2628_v1  ;;  %v847_v11 = vmul.f32 %v3031_v48, %v827_v62  ;;  %vm3185_vm2 = vcmp.ne.s32.totalorder %v945_v16, 0  ;;  %v950_v15 = vmax.f32 %v949_v8, 0.0  ;;  %v971_v21 = vsub.f32 %v2750_v19, %v3164_v60 }
  0x80   : > { %2262 = vmatpush3.msra.mxu0 %v681_v32  ;;  %vm3195_vm3 = vmand %vm942_vm1, %vm3185_vm2  ;;  %v990_v24 = vand.u32 2147483647, %v974_v3  ;;  %v1114_v48 = vadd.f32 %v1113_v28, %v2964_v37  ;;  %v989_v25 = vand.u32 2147483647, %v973_v9  ;;  %v988_v29 = vand.u32 2147483647, %v972_v10 }
  0x81   : > { %2264 = vmatmul.mubr.f32.vlgmr.msra.gmra.mxu0 %v3014_v26  ;;  %2301 = vmatprep.subr.mxu0 %v2628_v1  ;;  %v3200_v35 = vrot.slane %v950_v15, 1  ;;  %v987_v38 = vand.u32 2147483647, %v971_v21  ;;  %v970_v58 = vsub.f32 %v2752_v20, %v3164_v60  ;;  %v969_v41 = vsub.f32 %v2761_v27, %v3164_v60 }
  0x82   : > { %2297 = vmatpush3.msra.mxu1 %v847_v11  ;;  %2333 = vmatprep.mubr.msk.f32.mxu0 %vm2629_vm0, %v2628_v1  ;;  %v1006_v37 = vsub.f32 1.0, %v990_v24  ;;  %vm1115_vm4 = vcmp.gt.f32.partialorder %v1114_v48, -1.0  ;;  %vm1116_vm5 = vcmp.lt.f32.partialorder %v1114_v48, 16.0  ;;  %v3211_v59 = vrot.slane %v1114_v48, %v2727_v7 }
  0x83   : > { %2299 = vmatmul.mubr.f32.vlgmr.msra.gmra.mxu1 %v3014_v26  ;;  %2336 = vmatprep.subr.mxu1 %v2628_v1  ;;  %v954_v61 = vsel %vm3195_vm3, %v3200_v35, 0.0  ;;  %vm1117_vm6 = vmand %vm1115_vm4, %vm1116_vm5  ;;  %v1005_v42 = vsub.f32 1.0, %v989_v25  ;;  %v1004_v43 = vsub.f32 1.0, %v988_v29  ;;  %v1003_v33 = vsub.f32 1.0, %v987_v38 }
  0x84   : > { %2368 = vmatprep.mubr.msk.f32.mxu1 %vm2629_vm0, %v2628_v1  ;;  %v1022_v26 = vmax.f32 %v1006_v37, 0.0  ;;  %v3219_v34 = vrot.slane %v954_v61, %v2724_v6  ;;  %vm1118_vm7 = vmand %vm1117_vm6, %vm3167_vm15  ;;  %v1140_v0 = vsub.f32 %v2738_v12, %v3211_v59  ;;  %v1139_v46 = vsub.f32 %v2746_v17, %v3211_v59 }
  0x85   : > { %vm1119_vm10 = vmand %vm1118_vm7, %vm3185_vm2  ;;  %v1021_v50 = vmax.f32 %v1005_v42, 0.0  ;;  %v1020_v47 = vmax.f32 %v1004_v43, 0.0  ;;  %v1138_v51 = vsub.f32 %v2748_v18, %v3211_v59  ;;  %v1019_v53 = vmax.f32 %v1003_v33, 0.0 }
  0x86   : > { %v1042_v54 = vmul.f32 %v3219_v34, %v1022_v26  ;;  %v1120_v55 = vsel %vm1119_vm10, %v3200_v35, 0.0  ;;  %v1156_v56 = vand.u32 2147483647, %v1140_v0  ;;  %v1155_v32 = vand.u32 2147483647, %v1139_v46 }
  0x87   : > { %v3234_v36 = vrot.slane %v1120_v55, %v2727_v7  ;;  %v1041_v62 = vmul.f32 %v3219_v34, %v1021_v50  ;;  %v1040_v16 = vmul.f32 %v3219_v34, %v1020_v47  ;;  %v1154_v8 = vand.u32 2147483647, %v1138_v51 }
  0x88   : > { %2302 = vmatpush3.msra.mxu0 %v1042_v54  ;;  %v1172_v3 = vsub.f32 1.0, %v1156_v56  ;;  %v1171_v28 = vsub.f32 1.0, %v1155_v32  ;;  %v1039_v9 = vmul.f32 %v3219_v34, %v1019_v53  ;;  %v1137_v10 = vsub.f32 %v2750_v19, %v3211_v59 }
  0x89   : > { %2303 = vmatprep.subr.mxu0 %v2628_v1  ;;  %v1170_v11 = vsub.f32 1.0, %v1154_v8  ;;  %v986_v15 = vand.u32 2147483647, %v970_v58  ;;  %v1136_v7 = vsub.f32 %v2752_v20, %v3211_v59  ;;  %v985_v21 = vand.u32 2147483647, %v969_v41 }
  0x8a   : > { %v1188_v22 = vmax.f32 %v1172_v3, 0.0  ;;  %2304 = vmatpush3.msra.mxu0 %v1041_v62  ;;  %v1187_v24 = vmax.f32 %v1171_v28, 0.0  ;;  %v1153_v48 = vand.u32 2147483647, %v1137_v10  ;;  %v1135_v25 = vsub.f32 %v2761_v27, %v3211_v59 }
  0x8b   : > { %2305 = vmatprep.subr.mxu0 %v2628_v1  ;;  %v1186_v29 = vmax.f32 %v1170_v11, 0.0  ;;  %v1002_v38 = vsub.f32 1.0, %v986_v15  ;;  %v1152_v37 = vand.u32 2147483647, %v1136_v7  ;;  %v1001_v61 = vsub.f32 1.0, %v985_v21 }
  0x8c   : > { %v1208_v42 = vmul.f32 %v3234_v36, %v1188_v22  ;;  %v1207_v58 = vmul.f32 %v3234_v36, %v1187_v24  ;;  %2306 = vmatpush3.msra.mxu0 %v1040_v16  ;;  %v1169_v43 = vsub.f32 1.0, %v1153_v48  ;;  %v1151_v41 = vand.u32 2147483647, %v1135_v25 }
  0x8d   : > { %v1206_v33 = vmul.f32 %v3234_v36, %v1186_v29  ;;  %2307 = vmatprep.subr.mxu0 %v2628_v1  ;;  %v1018_v26 = vmax.f32 %v1002_v38, 0.0  ;;  %v1168_v0 = vsub.f32 1.0, %v1152_v37  ;;  %v1017_v46 = vmax.f32 %v1001_v61, 0.0 }
  0x8e   : > { %2337 = vmatpush3.msra.mxu1 %v1208_v42  ;;  %2308 = vmatpush3.msra.mxu0 %v1039_v9  ;;  %v1185_v50 = vmax.f32 %v1169_v43, 0.0  ;;  %v1167_v47 = vsub.f32 1.0, %v1151_v41  ;;  %v968_v51 = vsub.f32 %v2846_v44, %v3164_v60  ;;  %v1134_v53 = vsub.f32 %v2846_v44, %v3211_v59 }
  0x8f   : > { %2338 = vmatprep.subr.mxu1 %v2628_v1  ;;  %2309 = vmatprep.subr.mxu0 %v2628_v1  ;;  %v1038_v54 = vmul.f32 %v3219_v34, %v1018_v26  ;;  %v1184_v55 = vmax.f32 %v1168_v0, 0.0  ;;  %v1037_v56 = vmul.f32 %v3219_v34, %v1017_v46  ;;  %v967_v32 = vsub.f32 %v2862_v2, %v3164_v60 }
  0x90   : > { %2339 = vmatpush3.msra.mxu1 %v1207_v58  ;;  %v1205_v62 = vmul.f32 %v3234_v36, %v1185_v50  ;;  %v1183_v16 = vmax.f32 %v1167_v47, 0.0  ;;  %v984_v8 = vand.u32 2147483647, %v968_v51  ;;  %v1150_v3 = vand.u32 2147483647, %v1134_v53 }
  0x91   : > { %2340 = vmatprep.subr.mxu1 %v2628_v1  ;;  %2310 = vmatpush3.msra.mxu0 %v1038_v54  ;;  %v1204_v28 = vmul.f32 %v3234_v36, %v1184_v55  ;;  %v983_v9 = vand.u32 2147483647, %v967_v32  ;;  %v1133_v10 = vsub.f32 %v2862_v2, %v3211_v59  ;;  %v966_v11 = vsub.f32 %v2864_v5, %v3164_v60 }
  0x92   : > { %2341 = vmatpush3.msra.mxu1 %v1206_v33  ;;  %2311 = vmatprep.subr.mxu0 %v2628_v1  ;;  %v1203_v15 = vmul.f32 %v3234_v36, %v1183_v16  ;;  %v1000_v7 = vsub.f32 1.0, %v984_v8  ;;  %v1166_v21 = vsub.f32 1.0, %v1150_v3  ;;  %v1132_v22 = vsub.f32 %v2864_v5, %v3211_v59 }
  0x93   : > { %2342 = vmatprep.subr.mxu1 %v2628_v1  ;;  %2312 = vmatpush3.msra.mxu0 %v1037_v56  ;;  %v999_v24 = vsub.f32 1.0, %v983_v9  ;;  %v1149_v48 = vand.u32 2147483647, %v1133_v10  ;;  %v982_v25 = vand.u32 2147483647, %v966_v11  ;;  %v965_v29 = vsub.f32 %v2881_v30, %v3164_v60 }
  0x94   : > { %2343 = vmatpush3.msra.mxu1 %v1205_v62  ;;  %2313 = vmatprep.subr.mxu0 %v2628_v1  ;;  %v1016_v38 = vmax.f32 %v1000_v7, 0.0  ;;  %v1182_v37 = vmax.f32 %v1166_v21, 0.0  ;;  %v1148_v61 = vand.u32 2147483647, %v1132_v22  ;;  %v1131_v42 = vsub.f32 %v2881_v30, %v3211_v59 }
  0x95   : > { %2344 = vmatprep.subr.mxu1 %v2628_v1  ;;  %v1015_v58 = vmax.f32 %v999_v24, 0.0  ;;  %v1165_v43 = vsub.f32 1.0, %v1149_v48  ;;  %v998_v41 = vsub.f32 1.0, %v982_v25  ;;  %v981_v33 = vand.u32 2147483647, %v965_v29 }
  0x96   : > { %2345 = vmatpush3.msra.mxu1 %v1204_v28  ;;  %v1036_v26 = vmul.f32 %v3219_v34, %v1016_v38  ;;  %v1202_v0 = vmul.f32 %v3234_v36, %v1182_v37  ;;  %v1164_v46 = vsub.f32 1.0, %v1148_v61  ;;  %v1147_v50 = vand.u32 2147483647, %v1131_v42 }
  0x97   : > { %2346 = vmatprep.subr.mxu1 %v2628_v1  ;;  %v1035_v47 = vmul.f32 %v3219_v34, %v1015_v58  ;;  %v1181_v51 = vmax.f32 %v1165_v43, 0.0  ;;  %v1014_v53 = vmax.f32 %v998_v41, 0.0  ;;  %v997_v54 = vsub.f32 1.0, %v981_v33 }
  0x98   : > { %2347 = vmatpush3.msra.mxu1 %v1203_v15  ;;  %2314 = vmatpush3.msra.mxu0 %v1036_v26  ;;  %v1180_v55 = vmax.f32 %v1164_v46, 0.0  ;;  %v1163_v56 = vsub.f32 1.0, %v1147_v50  ;;  %v964_v32 = vsub.f32 %v2892_v49, %v3164_v60  ;;  %v1130_v62 = vsub.f32 %v2892_v49, %v3211_v59 }
  0x99   : > { %2348 = vmatprep.subr.mxu1 %v2628_v1  ;;  %2315 = vmatprep.subr.mxu0 %v2628_v1  ;;  %v1201_v16 = vmul.f32 %v3234_v36, %v1181_v51  ;;  %v1034_v8 = vmul.f32 %v3219_v34, %v1014_v53  ;;  %v1013_v3 = vmax.f32 %v997_v54, 0.0  ;;  %v963_v28 = vsub.f32 %v2905_v14, %v3164_v60 }
  0x9a   : > { %2349 = vmatpush3.msra.mxu1 %v1202_v0  ;;  %2316 = vmatpush3.msra.mxu0 %v1035_v47  ;;  %v1200_v9 = vmul.f32 %v3234_v36, %v1180_v55  ;;  %v1179_v10 = vmax.f32 %v1163_v56, 0.0  ;;  %v980_v11 = vand.u32 2147483647, %v964_v32  ;;  %v1146_v15 = vand.u32 2147483647, %v1130_v62 }
  0x9b   : > { %2350 = vmatprep.subr.mxu1 %v2628_v1  ;;  %2317 = vmatprep.subr.mxu0 %v2628_v1  ;;  %v1033_v7 = vmul.f32 %v3219_v34, %v1013_v3  ;;  %v979_v21 = vand.u32 2147483647, %v963_v28  ;;  %v1129_v22 = vsub.f32 %v2905_v14, %v3211_v59  ;;  %v962_v24 = vsub.f32 %v2916_v31, %v3164_v60 }
  0x9c   : > { %2351 = vmatpush3.msra.mxu1 %v1201_v16  ;;  %2318 = vmatpush3.msra.mxu0 %v1034_v8  ;;  %v1199_v48 = vmul.f32 %v3234_v36, %v1179_v10  ;;  %v996_v25 = vsub.f32 1.0, %v980_v11  ;;  %v1162_v29 = vsub.f32 1.0, %v1146_v15  ;;  %v1128_v38 = vsub.f32 %v2916_v31, %v3211_v59 }
  0x9d   : > { %2352 = vmatprep.subr.mxu1 %v2628_v1  ;;  %2319 = vmatprep.subr.mxu0 %v2628_v1  ;;  %v995_v37 = vsub.f32 1.0, %v979_v21  ;;  %v1145_v61 = vand.u32 2147483647, %v1129_v22  ;;  %v978_v42 = vand.u32 2147483647, %v962_v24  ;;  %v961_v58 = vsub.f32 %v2922_v40, %v3164_v60 }
  0x9e   : > { %2353 = vmatpush3.msra.mxu1 %v1200_v9  ;;  %2320 = vmatpush3.msra.mxu0 %v1033_v7  ;;  %v1012_v43 = vmax.f32 %v996_v25, 0.0  ;;  %v1178_v41 = vmax.f32 %v1162_v29, 0.0  ;;  %v1144_v33 = vand.u32 2147483647, %v1128_v38  ;;  %v1127_v26 = vsub.f32 %v2922_v40, %v3211_v59 }
  0x9f   : > { %2354 = vmatprep.subr.mxu1 %v2628_v1  ;;  %2321 = vmatprep.subr.mxu0 %v2628_v1  ;;  %v1011_v0 = vmax.f32 %v995_v37, 0.0  ;;  %v1161_v46 = vsub.f32 1.0, %v1145_v61  ;;  %v994_v50 = vsub.f32 1.0, %v978_v42  ;;  %v977_v47 = vand.u32 2147483647, %v961_v58 }
  0xa0   : > { %2355 = vmatpush3.msra.mxu1 %v1199_v48  ;;  %v1032_v51 = vmul.f32 %v3219_v34, %v1012_v43  ;;  %v1198_v53 = vmul.f32 %v3234_v36, %v1178_v41  ;;  %v1160_v54 = vsub.f32 1.0, %v1144_v33  ;;  %v1143_v55 = vand.u32 2147483647, %v1127_v26  ;;  %v2548_v33 = vld [vmem:[%s2736_s30 + $0x8] sm:$0xff] }
  0xa1   : > { %2356 = vmatprep.subr.mxu1 %v2628_v1  ;;  %v1031_v56 = vmul.f32 %v3219_v34, %v1011_v0  ;;  %v1177_v32 = vmax.f32 %v1161_v46, 0.0  ;;  %v1010_v62 = vmax.f32 %v994_v50, 0.0  ;;  %v993_v16 = vsub.f32 1.0, %v977_v47  ;;  %v3338_v0 = vld [vmem:[%s2736_s30 + $0x10] sm:$0x3]  ;;  %s2554_s30 = sshll.u32 %s2631_s15, 4  ;;  %s2555_s30 = int_to_ptr.vmem [resolvable:$false] %s2554_s30 }
  0xa2   : > { %2322 = vmatpush3.msra.mxu0 %v1032_v51  ;;  %2357 = vmatpush3.msra.mxu1 %v1198_v53  ;;  %v1176_v8 = vmax.f32 %v1160_v54, 0.0  ;;  %v1159_v3 = vsub.f32 1.0, %v1143_v55  ;;  %v960_v28 = vsub.f32 %v2928_v45, %v3164_v60  ;;  %v1126_v9 = vsub.f32 %v2928_v45, %v3211_v59  ;;  %s2556_s4 = scalar_lea.vmem %s2555_s30, 256  ;;  %p2557_p1 = scmp.lt.s32.totalorder %s3634_s19, %s2555_s30 }
  0xa3   : > { %2323 = vmatprep.subr.mxu0 %v2628_v1  ;;  %2358 = vmatprep.subr.mxu1 %v2628_v1  ;;  %v1197_v10 = vmul.f32 %v3234_v36, %v1177_v32  ;;  %v1030_v11 = vmul.f32 %v3219_v34, %v1010_v62  ;;  %v1009_v15 = vmax.f32 %v993_v16, 0.0  ;;  %v959_v7 = vsub.f32 %v2949_v39, %v3164_v60  ;;  %p2558_p2 = scmp.lt.s32.totalorder %s2556_s4, %s2550_s29 }
  0xa4   : > { %2324 = vmatpush3.msra.mxu0 %v1031_v56  ;;  %v1196_v21 = vmul.f32 %v3234_v36, %v1176_v8  ;;  %v1175_v22 = vmax.f32 %v1159_v3, 0.0  ;;  %v976_v24 = vand.u32 2147483647, %v960_v28  ;;  %v1142_v48 = vand.u32 2147483647, %v1126_v9 }
  0xa5   : > { %2359 = vmatpush3.msra.mxu1 %v1197_v10  ;;  %2325 = vmatprep.subr.mxu0 %v2628_v1  ;;  %v1029_v25 = vmul.f32 %v3219_v34, %v1009_v15  ;;  %v975_v29 = vand.u32 2147483647, %v959_v7  ;;  %v1125_v38 = vsub.f32 %v2949_v39, %v3211_v59  ;;  %v1279_v37 = vadd.f32 2.0, %v2720_v4  ;;  %p2559_p3 = por %p2558_p2, %p2557_p1 }
  0xa6   : > { %2360 = vmatprep.subr.mxu1 %v2628_v1  ;;  %2326 = vmatpush3.msra.mxu0 %v1030_v11  ;;  %v1195_v60 = vmul.f32 %v3234_v36, %v1175_v22  ;;  %v992_v61 = vsub.f32 1.0, %v976_v24  ;;  %v1158_v42 = vsub.f32 1.0, %v1142_v48  ;;  %v1445_v58 = vadd.f32 3.0, %v2720_v4  ;;  %v3386_v22 = vld [vmem:[%s2990_s7] sm:$0xf] }
  0xa7   : > { %2361 = vmatpush3.msra.mxu1 %v1196_v21  ;;  %2327 = vmatprep.subr.mxu0 %v2628_v1  ;;  %v991_v43 = vsub.f32 1.0, %v975_v29  ;;  %v1141_v41 = vand.u32 2147483647, %v1125_v38  ;;  %v1280_v26 = vadd.f32 %v2548_v33, %v1279_v37  ;;  %v3341_v59 = vadd.f32 4.0, %v2720_v4  ;;  %p2560_p5 = pnand %p2559_p3, %p2553_p0 }
  0xa8   : > { %2362 = vmatprep.subr.mxu1 %v2628_v1  ;;  %2328 = vmatpush3.msra.mxu0 %v1029_v25  ;;  %v1008_v46 = vmax.f32 %v992_v61, 0.0  ;;  %v1174_v50 = vmax.f32 %v1158_v42, 0.0  ;;  %v1446_v47 = vadd.f32 %v2548_v33, %v1445_v58  ;;  %vm1616_vm11 = vcmp.gt.f32.partialorder %v3338_v0, -1.0 }
  0xa9   : > { %2363 = vmatpush3.msra.mxu1 %v1195_v60  ;;  %2329 = vmatprep.subr.mxu0 %v2628_v1  ;;  %v1007_v51 = vmax.f32 %v991_v43, 0.0  ;;  %v1157_v53 = vsub.f32 1.0, %v1141_v41  ;;  %vm1281_vm8 = vcmp.gt.f32.partialorder %v1280_v26, -1.0  ;;  %vm1282_vm9 = vcmp.lt.f32.partialorder %v1280_v26, 16.0 }
  0xaa   : > { %2364 = vmatprep.subr.mxu1 %v2628_v1  ;;  %v1028_v4 = vmul.f32 %v3219_v34, %v1008_v46  ;;  %v1194_v54 = vmul.f32 %v3234_v36, %v1174_v50  ;;  %vm1283_vm12 = vmand %vm1281_vm8, %vm1282_vm9  ;;  %v3350_v55 = vrot.slane %v1280_v26, %v2961_v52  ;;  %vm1447_vm13 = vcmp.gt.f32.partialorder %v1446_v47, -1.0 }
  0xab   : > { %v1027_v56 = vmul.f32 %v3219_v34, %v1007_v51  ;;  %v1173_v32 = vmax.f32 %v1157_v53, 0.0  ;;  %vm1284_vm14 = vmand %vm1283_vm12, %vm3167_vm15  ;;  %vm1448_vm1 = vcmp.lt.f32.partialorder %v1446_v47, 16.0  ;;  %v3356_v62 = vrot.slane %v1446_v47, %v2974_v57 }
  0xac   : > { %2330 = vmatpush3.msra.mxu0 %v1028_v4  ;;  %2365 = vmatpush3.msra.mxu1 %v1194_v54  ;;  %vm1285_vm3 = vmand %vm1284_vm14, %vm3185_vm2  ;;  %v1306_v16 = vsub.f32 %v2738_v12, %v3350_v55  ;;  %v1305_v8 = vsub.f32 %v2746_v17, %v3350_v55  ;;  %v1304_v34 = vsub.f32 %v2748_v18, %v3350_v55  ;;  %v3369_v3 = vsel %vm1616_vm11, 1, %v2630_v23 }
  0xad   : > { %2331 = vmatprep.subr.mxu0 %v2628_v1  ;;  %2366 = vmatprep.subr.mxu1 %v2628_v1  ;;  %v1193_v28 = vmul.f32 %v3234_v36, %v1173_v32  ;;  %v1286_v9 = vsel %vm1285_vm3, %v3200_v35, 0.0  ;;  %vm1449_vm4 = vmand %vm1447_vm13, %vm1448_vm1  ;;  %v1472_v10 = vsub.f32 %v2738_v12, %v3356_v62  ;;  %v1471_v11 = vsub.f32 %v2746_v17, %v3356_v62 }
  0xae   : > { %2332 = vmatpush3.msra.mxu0 %v1027_v56  ;;  %v1322_v15 = vand.u32 2147483647, %v1306_v16  ;;  %v3381_v7 = vrot.slane %v1286_v9, %v2961_v52  ;;  %vm1450_vm5 = vmand %vm1449_vm4, %vm3167_vm15  ;;  %v1321_v21 = vand.u32 2147483647, %v1305_v8  ;;  %v1320_v36 = vand.u32 2147483647, %v1304_v34 }
  0xaf   : > { %2367 = vmatpush3.msra.mxu1 %v1193_v28  ;;  %2334 = vmatmul.mubr.f32.vlgmr.msra.gmra.mxu0 %v3386_v22  ;;  %vm1451_vm6 = vmand %vm1450_vm5, %vm3185_vm2  ;;  %v1488_v24 = vand.u32 2147483647, %v1472_v10  ;;  %v1487_v48 = vand.u32 2147483647, %v1471_v11  ;;  %v1470_v25 = vsub.f32 %v2748_v18, %v3356_v62  ;;  %v1303_v52 = vsub.f32 %v2750_v19, %v3350_v55 }
  0xb0   : > { %2369 = vmatmul.mubr.f32.vlgmr.msra.gmra.mxu1 %v3386_v22  ;;  %2371 = vmatprep.subr.mxu0 %v2628_v1  ;;  %v1338_v63 = vsub.f32 1.0, %v1322_v15  ;;  %v1452_v29 = vsel %vm1451_vm6, %v3200_v35, 0.0  ;;  %v1337_v38 = vsub.f32 1.0, %v1321_v21  ;;  %v1336_v37 = vsub.f32 1.0, %v1320_v36 }
  0xb1   : > { %2406 = vmatprep.subr.mxu1 %v2628_v1  ;;  %v1504_v13 = vsub.f32 1.0, %v1488_v24  ;;  %v3400_v60 = vrot.slane %v1452_v29, %v2974_v57  ;;  %v1503_v61 = vsub.f32 1.0, %v1487_v48  ;;  %v1486_v42 = vand.u32 2147483647, %v1470_v25  ;;  %2403 = vmatprep.mubr.msk.f32.mxu0 %vm2629_vm0, %v2628_v1 }
  0xb2   : > { %v1354_v58 = vmax.f32 %v1338_v63, 0.0  ;;  %v1353_v43 = vmax.f32 %v1337_v38, 0.0  ;;  %v1352_v41 = vmax.f32 %v1336_v37, 0.0  ;;  %v1319_v33 = vand.u32 2147483647, %v1303_v52  ;;  %2438 = vmatprep.mubr.msk.f32.mxu1 %vm2629_vm0, %v2628_v1 }
  0xb3   : > { %v1520_v35 = vmax.f32 %v1504_v13, 0.0  ;;  %v1519_v26 = vmax.f32 %v1503_v61, 0.0  ;;  %v1502_v46 = vsub.f32 1.0, %v1486_v42  ;;  %v1469_v50 = vsub.f32 %v2750_v19, %v3356_v62 }
  0xb4   : > { %v1374_v57 = vmul.f32 %v3381_v7, %v1354_v58  ;;  %v1373_v47 = vmul.f32 %v3381_v7, %v1353_v43  ;;  %v1372_v51 = vmul.f32 %v3381_v7, %v1352_v41  ;;  %v1335_v53 = vsub.f32 1.0, %v1319_v33 }
  0xb5   : > { %v1540_v4 = vmul.f32 %v3400_v60, %v1520_v35  ;;  %v1539_v54 = vmul.f32 %v3400_v60, %v1519_v26  ;;  %v1518_v56 = vmax.f32 %v1502_v46, 0.0  ;;  %v1485_v32 = vand.u32 2147483647, %v1469_v50 }
  0xb6   : > { %2372 = vmatpush3.msra.mxu0 %v1374_v57  ;;  %v1351_v16 = vmax.f32 %v1335_v53, 0.0  ;;  %v1302_v8 = vsub.f32 %v2752_v20, %v3350_v55  ;;  %v1468_v34 = vsub.f32 %v2752_v20, %v3356_v62  ;;  %v1301_v28 = vsub.f32 %v2761_v27, %v3350_v55 }
  0xb7   : > { %2407 = vmatpush3.msra.mxu1 %v1540_v4  ;;  %2373 = vmatprep.subr.mxu0 %v2628_v1  ;;  %v1538_v9 = vmul.f32 %v3400_v60, %v1518_v56  ;;  %v1501_v10 = vsub.f32 1.0, %v1485_v32  ;;  %v1467_v11 = vsub.f32 %v2761_v27, %v3356_v62  ;;  %v1300_v15 = vsub.f32 %v2846_v44, %v3350_v55 }
  0xb8   : > { %2408 = vmatprep.subr.mxu1 %v2628_v1  ;;  %2374 = vmatpush3.msra.mxu0 %v1373_v47  ;;  %v1371_v21 = vmul.f32 %v3381_v7, %v1351_v16  ;;  %v1318_v36 = vand.u32 2147483647, %v1302_v8  ;;  %v1484_v24 = vand.u32 2147483647, %v1468_v34  ;;  %v1317_v48 = vand.u32 2147483647, %v1301_v28 }
  0xb9   : > { %2409 = vmatpush3.msra.mxu1 %v1539_v54  ;;  %2375 = vmatprep.subr.mxu0 %v2628_v1  ;;  %v1517_v25 = vmax.f32 %v1501_v10, 0.0  ;;  %v1483_v52 = vand.u32 2147483647, %v1467_v11  ;;  %v1316_v63 = vand.u32 2147483647, %v1300_v15  ;;  %v1466_v29 = vsub.f32 %v2846_v44, %v3356_v62 }
  0xba   : > { %2410 = vmatprep.subr.mxu1 %v2628_v1  ;;  %2376 = vmatpush3.msra.mxu0 %v1372_v51  ;;  %v1334_v38 = vsub.f32 1.0, %v1318_v36  ;;  %v1500_v37 = vsub.f32 1.0, %v1484_v24  ;;  %v1333_v13 = vsub.f32 1.0, %v1317_v48  ;;  %v1299_v61 = vsub.f32 %v2862_v2, %v3350_v55 }
  0xbb   : > { %2411 = vmatpush3.msra.mxu1 %v1538_v9  ;;  %2377 = vmatprep.subr.mxu0 %v2628_v1  ;;  %v1537_v42 = vmul.f32 %v3400_v60, %v1517_v25  ;;  %v1499_v58 = vsub.f32 1.0, %v1483_v52  ;;  %v1332_v43 = vsub.f32 1.0, %v1316_v63  ;;  %v1482_v41 = vand.u32 2147483647, %v1466_v29 }
  0xbc   : > { %2412 = vmatprep.subr.mxu1 %v2628_v1  ;;  %2378 = vmatpush3.msra.mxu0 %v1371_v21  ;;  %v1350_v33 = vmax.f32 %v1334_v38, 0.0  ;;  %v1516_v35 = vmax.f32 %v1500_v37, 0.0  ;;  %v1349_v26 = vmax.f32 %v1333_v13, 0.0  ;;  %v1315_v46 = vand.u32 2147483647, %v1299_v61 }
  0xbd   : > { %2413 = vmatpush3.msra.mxu1 %v1537_v42  ;;  %2379 = vmatprep.subr.mxu0 %v2628_v1  ;;  %v1515_v50 = vmax.f32 %v1499_v58, 0.0  ;;  %v1348_v57 = vmax.f32 %v1332_v43, 0.0  ;;  %v1498_v47 = vsub.f32 1.0, %v1482_v41  ;;  %v1465_v51 = vsub.f32 %v2862_v2, %v3356_v62 }
  0xbe   : > { %2414 = vmatprep.subr.mxu1 %v2628_v1  ;;  %v1370_v53 = vmul.f32 %v3381_v7, %v1350_v33  ;;  %v1536_v4 = vmul.f32 %v3400_v60, %v1516_v35  ;;  %v1369_v54 = vmul.f32 %v3381_v7, %v1349_v26  ;;  %v1331_v56 = vsub.f32 1.0, %v1315_v46 }
  0xbf   : > { %v1535_v32 = vmul.f32 %v3400_v60, %v1515_v50  ;;  %v1368_v16 = vmul.f32 %v3381_v7, %v1348_v57  ;;  %v1514_v8 = vmax.f32 %v1498_v47, 0.0  ;;  %v1481_v34 = vand.u32 2147483647, %v1465_v51 }
  0xc0   : > { %2380 = vmatpush3.msra.mxu0 %v1370_v53  ;;  %2415 = vmatpush3.msra.mxu1 %v1536_v4  ;;  %v1347_v28 = vmax.f32 %v1331_v56, 0.0  ;;  %v1298_v9 = vsub.f32 %v2864_v5, %v3350_v55  ;;  %v1464_v10 = vsub.f32 %v2864_v5, %v3356_v62  ;;  %v1297_v11 = vsub.f32 %v2881_v30, %v3350_v55 }
  0xc1   : > { %2381 = vmatprep.subr.mxu0 %v2628_v1  ;;  %2416 = vmatprep.subr.mxu1 %v2628_v1  ;;  %v1534_v15 = vmul.f32 %v3400_v60, %v1514_v8  ;;  %v1497_v21 = vsub.f32 1.0, %v1481_v34  ;;  %v1463_v36 = vsub.f32 %v2881_v30, %v3356_v62  ;;  %v1296_v24 = vsub.f32 %v2892_v49, %v3350_v55 }
  0xc2   : > { %2382 = vmatpush3.msra.mxu0 %v1369_v54  ;;  %2417 = vmatpush3.msra.mxu1 %v1535_v32  ;;  %v1367_v48 = vmul.f32 %v3381_v7, %v1347_v28  ;;  %v1314_v25 = vand.u32 2147483647, %v1298_v9  ;;  %v1480_v52 = vand.u32 2147483647, %v1464_v10  ;;  %v1313_v63 = vand.u32 2147483647, %v1297_v11 }
  0xc3   : > { %2383 = vmatprep.subr.mxu0 %v2628_v1  ;;  %2418 = vmatprep.subr.mxu1 %v2628_v1  ;;  %v1513_v29 = vmax.f32 %v1497_v21, 0.0  ;;  %v1479_v38 = vand.u32 2147483647, %v1463_v36  ;;  %v1312_v37 = vand.u32 2147483647, %v1296_v24  ;;  %v1462_v13 = vsub.f32 %v2892_v49, %v3356_v62 }
  0xc4   : > { %2384 = vmatpush3.msra.mxu0 %v1368_v16  ;;  %2419 = vmatpush3.msra.mxu1 %v1534_v15  ;;  %v1330_v61 = vsub.f32 1.0, %v1314_v25  ;;  %v1496_v42 = vsub.f32 1.0, %v1480_v52  ;;  %v1329_v58 = vsub.f32 1.0, %v1313_v63  ;;  %v1295_v43 = vsub.f32 %v2905_v14, %v3350_v55 }
  0xc5   : > { %2385 = vmatprep.subr.mxu0 %v2628_v1  ;;  %2420 = vmatprep.subr.mxu1 %v2628_v1  ;;  %v1533_v41 = vmul.f32 %v3400_v60, %v1513_v29  ;;  %v1495_v33 = vsub.f32 1.0, %v1479_v38  ;;  %v1328_v35 = vsub.f32 1.0, %v1312_v37  ;;  %v1478_v26 = vand.u32 2147483647, %v1462_v13 }
  0xc6   : > { %2386 = vmatpush3.msra.mxu0 %v1367_v48  ;;  %v1346_v46 = vmax.f32 %v1330_v61, 0.0  ;;  %v1512_v50 = vmax.f32 %v1496_v42, 0.0  ;;  %v1345_v57 = vmax.f32 %v1329_v58, 0.0  ;;  %v1311_v47 = vand.u32 2147483647, %v1295_v43 }
  0xc7   : > { %2421 = vmatpush3.msra.mxu1 %v1533_v41  ;;  %2387 = vmatprep.subr.mxu0 %v2628_v1  ;;  %v1511_v51 = vmax.f32 %v1495_v33, 0.0  ;;  %v1344_v53 = vmax.f32 %v1328_v35, 0.0  ;;  %v1494_v4 = vsub.f32 1.0, %v1478_v26  ;;  %v1461_v54 = vsub.f32 %v2905_v14, %v3356_v62 }
  0xc8   : > { %2422 = vmatprep.subr.mxu1 %v2628_v1  ;;  %v1366_v56 = vmul.f32 %v3381_v7, %v1346_v46  ;;  %v1532_v32 = vmul.f32 %v3400_v60, %v1512_v50  ;;  %v1365_v16 = vmul.f32 %v3381_v7, %v1345_v57  ;;  %v1327_v8 = vsub.f32 1.0, %v1311_v47 }
  0xc9   : > { %v1531_v34 = vmul.f32 %v3400_v60, %v1511_v51  ;;  %v1364_v28 = vmul.f32 %v3381_v7, %v1344_v53  ;;  %v1510_v9 = vmax.f32 %v1494_v4, 0.0  ;;  %v1477_v10 = vand.u32 2147483647, %v1461_v54 }
  0xca   : > { %2388 = vmatpush3.msra.mxu0 %v1366_v56  ;;  %2423 = vmatpush3.msra.mxu1 %v1532_v32  ;;  %v1343_v11 = vmax.f32 %v1327_v8, 0.0  ;;  %v1294_v15 = vsub.f32 %v2916_v31, %v3350_v55  ;;  %v1460_v21 = vsub.f32 %v2916_v31, %v3356_v62  ;;  %v1293_v36 = vsub.f32 %v2922_v40, %v3350_v55 }
  0xcb   : > { %2389 = vmatprep.subr.mxu0 %v2628_v1  ;;  %2424 = vmatprep.subr.mxu1 %v2628_v1  ;;  %v1530_v24 = vmul.f32 %v3400_v60, %v1510_v9  ;;  %v1493_v48 = vsub.f32 1.0, %v1477_v10  ;;  %v1459_v25 = vsub.f32 %v2922_v40, %v3356_v62  ;;  %v1292_v52 = vsub.f32 %v2928_v45, %v3350_v55 }
  0xcc   : > { %2390 = vmatpush3.msra.mxu0 %v1365_v16  ;;  %2425 = vmatpush3.msra.mxu1 %v1531_v34  ;;  %v1363_v63 = vmul.f32 %v3381_v7, %v1343_v11  ;;  %v1310_v29 = vand.u32 2147483647, %v1294_v15  ;;  %v1476_v38 = vand.u32 2147483647, %v1460_v21  ;;  %v1309_v37 = vand.u32 2147483647, %v1293_v36 }
  0xcd   : > { %2391 = vmatprep.subr.mxu0 %v2628_v1  ;;  %2426 = vmatprep.subr.mxu1 %v2628_v1  ;;  %v1509_v13 = vmax.f32 %v1493_v48, 0.0  ;;  %v1475_v61 = vand.u32 2147483647, %v1459_v25  ;;  %v1308_v42 = vand.u32 2147483647, %v1292_v52  ;;  %v1458_v58 = vsub.f32 %v2928_v45, %v3356_v62 }
  0xce   : > { %2392 = vmatpush3.msra.mxu0 %v1364_v28  ;;  %2427 = vmatpush3.msra.mxu1 %v1530_v24  ;;  %v1326_v43 = vsub.f32 1.0, %v1310_v29  ;;  %v1492_v41 = vsub.f32 1.0, %v1476_v38  ;;  %v1325_v33 = vsub.f32 1.0, %v1309_v37  ;;  %v1291_v35 = vsub.f32 %v2949_v39, %v3350_v55 }
  0xcf   : > { %2393 = vmatprep.subr.mxu0 %v2628_v1  ;;  %2428 = vmatprep.subr.mxu1 %v2628_v1  ;;  %v1529_v26 = vmul.f32 %v3400_v60, %v1509_v13  ;;  %v1491_v46 = vsub.f32 1.0, %v1475_v61  ;;  %v1324_v50 = vsub.f32 1.0, %v1308_v42  ;;  %v1474_v57 = vand.u32 2147483647, %v1458_v58 }
  0xd0   : > { %2394 = vmatpush3.msra.mxu0 %v1363_v63  ;;  %v1342_v47 = vmax.f32 %v1326_v43, 0.0  ;;  %v1508_v51 = vmax.f32 %v1492_v41, 0.0  ;;  %v1341_v53 = vmax.f32 %v1325_v33, 0.0  ;;  %v1307_v4 = vand.u32 2147483647, %v1291_v35 }
  0xd1   : > { %2429 = vmatpush3.msra.mxu1 %v1529_v26  ;;  %2395 = vmatprep.subr.mxu0 %v2628_v1  ;;  %v1507_v54 = vmax.f32 %v1491_v46, 0.0  ;;  %v1340_v56 = vmax.f32 %v1324_v50, 0.0  ;;  %v1490_v55 = vsub.f32 1.0, %v1474_v57  ;;  %v1457_v32 = vsub.f32 %v2949_v39, %v3356_v62 }
  0xd2   : > { %2430 = vmatprep.subr.mxu1 %v2628_v1  ;;  %v1362_v16 = vmul.f32 %v3381_v7, %v1342_v47  ;;  %v1528_v8 = vmul.f32 %v3400_v60, %v1508_v51  ;;  %v1361_v34 = vmul.f32 %v3381_v7, %v1341_v53  ;;  %v1323_v28 = vsub.f32 1.0, %v1307_v4 }
  0xd3   : > { %v1527_v9 = vmul.f32 %v3400_v60, %v1507_v54  ;;  %v1360_v10 = vmul.f32 %v3381_v7, %v1340_v56  ;;  %v1506_v11 = vmax.f32 %v1490_v55, 0.0  ;;  %v1473_v15 = vand.u32 2147483647, %v1457_v32 }
  0xd4   : > { %2396 = vmatpush3.msra.mxu0 %v1362_v16  ;;  %2431 = vmatpush3.msra.mxu1 %v1528_v8  ;;  %v1339_v21 = vmax.f32 %v1323_v28, 0.0  ;;  %v1612_v62 = vadd.f32 %v3341_v59, %v3338_v0  ;;  %v1618_v36 = vrot.slane %v3369_v3, 1  ;;  %vm1621_vm15 = vcmp.lt.f32.partialorder %v3338_v0, 1.0 }
  0xd5   : > { %2397 = vmatprep.subr.mxu0 %v2628_v1  ;;  %2432 = vmatprep.subr.mxu1 %v2628_v1  ;;  %v1526_v24 = vmul.f32 %v3400_v60, %v1506_v11  ;;  %v1489_v48 = vsub.f32 1.0, %v1473_v15  ;;  %v1622_v25 = vsel %vm1621_vm15, 1, %v2630_v23  ;;  %v1626_v52 = vand.u32 2147483647, %v3338_v0 }
  0xd6   : > { %2398 = vmatpush3.msra.mxu0 %v1361_v34  ;;  %2433 = vmatpush3.msra.mxu1 %v1527_v9  ;;  %v1359_v63 = vmul.f32 %v3381_v7, %v1339_v21  ;;  %vm1613_vm2 = vcmp.gt.f32.partialorder %v1612_v62, -1.0  ;;  %vm1614_vm7 = vcmp.lt.f32.partialorder %v1612_v62, 16.0  ;;  %vm3519_vm10 = vcmp.ne.s32.totalorder %v1618_v36, 0 }
  0xd7   : > { %2399 = vmatprep.subr.mxu0 %v2628_v1  ;;  %2434 = vmatprep.subr.mxu1 %v2628_v1  ;;  %v1505_v3 = vmax.f32 %v1489_v48, 0.0  ;;  %vm3525_vm11 = vmand %vm1613_vm2, %vm1614_vm7  ;;  %v1623_v23 = vrot.slane %v1622_v25, 1  ;;  %v1627_v0 = vsub.f32 1.0, %v1626_v52  ;;  %v3530_v38 = vrot.slane %v1612_v62, %v2724_v6 }
  0xd8   : > { %2400 = vmatpush3.msra.mxu0 %v1360_v10  ;;  %2435 = vmatpush3.msra.mxu1 %v1526_v24  ;;  %vm1620_vm8 = vmand %vm3525_vm11, %vm3519_vm10  ;;  %vm1809_vm13 = vcmask 293888  }
  0xd9   : > { %2401 = vmatprep.subr.mxu0 %v2628_v1  ;;  %2436 = vmatprep.subr.mxu1 %v2628_v1  ;;  %v1525_v7 = vmul.f32 %v3400_v60, %v1505_v3  ;;  %vm1624_vm9 = vcmp.ne.s32.totalorder %v1623_v23, 0  ;;  %v1628_v37 = vmax.f32 %v1627_v0, 0.0  ;;  %v1652_v13 = vsub.f32 %v2738_v12, %v3530_v38 }
  0xda   : > { %2402 = vmatpush3.msra.mxu0 %v1359_v63  ;;  %vm3541_vm12 = vmand %vm1620_vm8, %vm1624_vm9  ;;  %v1651_v42 = vsub.f32 %v2746_v17, %v3530_v38  ;;  %v1650_v58 = vsub.f32 %v2748_v18, %v3530_v38  ;;  %v1649_v43 = vsub.f32 %v2750_v19, %v3530_v38  ;;  %v1648_v60 = vsub.f32 %v2752_v20, %v3530_v38 }
  0xdb   : > { %2437 = vmatpush3.msra.mxu1 %v1525_v7  ;;  %2404 = vmatmul.mubr.f32.vlgmr.msra.gmra.mxu0 %v3386_v22  ;;  %v1630_v12 = vrot.slane %v1628_v37, 1  ;;  %v1668_v41 = vand.u32 2147483647, %v1652_v13  ;;  %v1647_v33 = vsub.f32 %v2761_v27, %v3530_v38  ;;  %v1646_v17 = vsub.f32 %v2846_v44, %v3530_v38 }
  0xdc   : > { %2439 = vmatmul.mubr.f32.vlgmr.msra.gmra.mxu1 %v3386_v22  ;;  %2441 = vmatprep.subr.mxu0 %v2628_v1  ;;  %v1667_v18 = vand.u32 2147483647, %v1651_v42  ;;  %v1666_v19 = vand.u32 2147483647, %v1650_v58  ;;  %v1665_v35 = vand.u32 2147483647, %v1649_v43  ;;  %v1645_v20 = vsub.f32 %v2862_v2, %v3530_v38 }
  0xdd   : > { %v1632_v26 = vsel %vm3541_vm12, %v1630_v12, 0.0  ;;  %v1684_v46 = vsub.f32 1.0, %v1668_v41  ;;  %v1664_v50 = vand.u32 2147483647, %v1648_v60  ;;  %v1663_v57 = vand.u32 2147483647, %v1647_v33  ;;  %2473 = vmatprep.mubr.msk.f32.mxu0 %vm2629_vm0, %v2628_v1  ;;  %2476 = vmatprep.subr.mxu1 %v2628_v1 }
  0xde   : > { %v3568_v27 = vrot.slane %v1632_v26, %v2724_v6  ;;  %v1683_v44 = vsub.f32 1.0, %v1667_v18  ;;  %v1682_v47 = vsub.f32 1.0, %v1666_v19  ;;  %v1681_v51 = vsub.f32 1.0, %v1665_v35  ;;  %2486 = vmatprep.mubr.msk.f32.mxu1 %vm2629_vm0, %v2628_v1 }
  0xdf   : > { %v1700_v2 = vmax.f32 %v1684_v46, 0.0  ;;  %v1680_v53 = vsub.f32 1.0, %v1664_v50  ;;  %v1662_v4 = vand.u32 2147483647, %v1646_v17  ;;  %v1661_v55 = vand.u32 2147483647, %v1645_v20 }
  0xe0   : > { %v1699_v54 = vmax.f32 %v1683_v44, 0.0  ;;  %v1698_v56 = vmax.f32 %v1682_v47, 0.0  ;;  %v1697_v16 = vmax.f32 %v1681_v51, 0.0  ;;  %v1679_v8 = vsub.f32 1.0, %v1663_v57 }
  0xe1   : > { %v1720_v32 = vmul.f32 %v3568_v27, %v1700_v2  ;;  %v1678_v6 = vsub.f32 1.0, %v1662_v4  ;;  %v1696_v9 = vmax.f32 %v1680_v53, 0.0  ;;  %v1644_v10 = vsub.f32 %v2864_v5, %v3530_v38 }
  0xe2   : > { %v1719_v34 = vmul.f32 %v3568_v27, %v1699_v54  ;;  %v1718_v28 = vmul.f32 %v3568_v27, %v1698_v56  ;;  %v1677_v11 = vsub.f32 1.0, %v1661_v55  ;;  %v1643_v15 = vsub.f32 %v2881_v30, %v3530_v38 }
  0xe3   : > { %2442 = vmatpush3.msra.mxu0 %v1720_v32  ;;  %v1642_v21 = vsub.f32 %v2892_v49, %v3530_v38  ;;  %v1717_v62 = vmul.f32 %v3568_v27, %v1697_v16  ;;  %v1695_v36 = vmax.f32 %v1679_v8, 0.0  ;;  %v1660_v24 = vand.u32 2147483647, %v1644_v10 }
  0xe4   : > { %2443 = vmatprep.subr.mxu0 %v2628_v1  ;;  %v1641_v48 = vsub.f32 %v2905_v14, %v3530_v38  ;;  %v1694_v5 = vmax.f32 %v1678_v6, 0.0  ;;  %v1659_v25 = vand.u32 2147483647, %v1643_v15  ;;  %v1716_v52 = vmul.f32 %v3568_v27, %v1696_v9 }
  0xe5   : > { %2444 = vmatpush3.msra.mxu0 %v1719_v34  ;;  %v1676_v63 = vsub.f32 1.0, %v1660_v24  ;;  %v1658_v30 = vand.u32 2147483647, %v1642_v21  ;;  %v1640_v49 = vsub.f32 %v2916_v31, %v3530_v38  ;;  %v1693_v59 = vmax.f32 %v1677_v11, 0.0 }
  0xe6   : > { %2445 = vmatprep.subr.mxu0 %v2628_v1  ;;  %v1715_v3 = vmul.f32 %v3568_v27, %v1695_v36  ;;  %v1675_v29 = vsub.f32 1.0, %v1659_v25  ;;  %v1657_v14 = vand.u32 2147483647, %v1641_v48  ;;  %v1639_v23 = vsub.f32 %v2922_v40, %v3530_v38 }
  0xe7   : > { %2446 = vmatpush3.msra.mxu0 %v1718_v28  ;;  %v1714_v0 = vmul.f32 %v3568_v27, %v1694_v5  ;;  %v1692_v7 = vmax.f32 %v1676_v63, 0.0  ;;  %v1674_v37 = vsub.f32 1.0, %v1658_v30  ;;  %v1656_v13 = vand.u32 2147483647, %v1640_v49  ;;  %v1808_v30 = vld [vmem:[%s3685_s2] sm:$0xff] }
  0xe8   : > { %2447 = vmatprep.subr.mxu0 %v2628_v1  ;;  %v1638_v31 = vsub.f32 %v2928_v45, %v3530_v38  ;;  %v1713_v61 = vmul.f32 %v3568_v27, %v1693_v59  ;;  %v1691_v42 = vmax.f32 %v1675_v29, 0.0  ;;  %v1673_v58 = vsub.f32 1.0, %v1657_v14 }
  0xe9   : > { %2448 = vmatpush3.msra.mxu0 %v1717_v62  ;;  %v1655_v43 = vand.u32 2147483647, %v1639_v23  ;;  %v1637_v40 = vsub.f32 %v2949_v39, %v3530_v38  ;;  %v1712_v60 = vmul.f32 %v3568_v27, %v1692_v7  ;;  %v1690_v12 = vmax.f32 %v1674_v37, 0.0 }
  0xea   : > { %2449 = vmatprep.subr.mxu0 %v2628_v1  ;;  %v1672_v41 = vsub.f32 1.0, %v1656_v13  ;;  %v1654_v33 = vand.u32 2147483647, %v1638_v31  ;;  %v1711_v45 = vmul.f32 %v3568_v27, %v1691_v42  ;;  %v1689_v17 = vmax.f32 %v1673_v58, 0.0 }
  0xeb   : > { %2450 = vmatpush3.msra.mxu0 %v1716_v52  ;;  %v1671_v18 = vsub.f32 1.0, %v1655_v43  ;;  %v1653_v19 = vand.u32 2147483647, %v1637_v40  ;;  %v1710_v39 = vmul.f32 %v3568_v27, %v1690_v12  ;;  %vm1803_vm0 = vcmask 1043456  }
  0xec   : > { %2451 = vmatprep.subr.mxu0 %v2628_v1  ;;  %v1688_v38 = vmax.f32 %v1672_v41, 0.0  ;;  %v1670_v35 = vsub.f32 1.0, %v1654_v33  ;;  %v1709_v20 = vmul.f32 %v3568_v27, %v1689_v17 }
  0xed   : > { %2452 = vmatpush3.msra.mxu0 %v1715_v3  ;;  %v1687_v26 = vmax.f32 %v1671_v18, 0.0  ;;  %v1669_v46 = vsub.f32 1.0, %v1653_v19 }
  0xee   : > { %2453 = vmatprep.subr.mxu0 %v2628_v1  ;;  %v1708_v50 = vmul.f32 %v3568_v27, %v1688_v38  ;;  %v1686_v57 = vmax.f32 %v1670_v35, 0.0 }
  0xef   : > { %2454 = vmatpush3.msra.mxu0 %v1714_v0  ;;  %v1707_v44 = vmul.f32 %v3568_v27, %v1687_v26  ;;  %v1685_v47 = vmax.f32 %v1669_v46, 0.0 }
  0xf0   : > { %2455 = vmatprep.subr.mxu0 %v2628_v1  ;;  %v1706_v51 = vmul.f32 %v3568_v27, %v1686_v57 }
  0xf1   : > { %2456 = vmatpush3.msra.mxu0 %v1713_v61  ;;  %v1705_v2 = vmul.f32 %v3568_v27, %v1685_v47 }
  0xf2   : > { %2457 = vmatprep.subr.mxu0 %v2628_v1 }
  0xf3   : > { %2458 = vmatpush3.msra.mxu0 %v1712_v60 }
  0xf4   : > { %2459 = vmatprep.subr.mxu0 %v2628_v1 }
  0xf5   : > { %2460 = vmatpush3.msra.mxu0 %v1711_v45 }
  0xf6   : > { %2461 = vmatprep.subr.mxu0 %v2628_v1 }
  0xf7   : > { %2462 = vmatpush3.msra.mxu0 %v1710_v39 }
  0xf8   : > { %2463 = vmatprep.subr.mxu0 %v2628_v1 }
  0xf9   : > { %2464 = vmatpush3.msra.mxu0 %v1709_v20 }
  0xfa   : > { %2465 = vmatprep.subr.mxu0 %v2628_v1 }
  0xfb   : > { %2466 = vmatpush3.msra.mxu0 %v1708_v50 }
  0xfc   : > { %2467 = vmatprep.subr.mxu0 %v2628_v1 }
  0xfd   : > { %2468 = vmatpush3.msra.mxu0 %v1707_v44 }
  0xfe   : > { %2469 = vmatprep.subr.mxu0 %v2628_v1 }
  0xff   : > { %2470 = vmatpush3.msra.mxu0 %v1706_v51 }
 0x100   : > { %2471 = vmatprep.subr.mxu0 %v2628_v1 }
 0x101   : > { %2472 = vmatpush3.msra.mxu0 %v1705_v2 }
 0x102   : > { %2474 = vmatmul.mubr.f32.vlgmr.msra.gmra.mxu0 %v3386_v22 }
 0x117   : > { %v431_v53 = vpop.f32.mrf.mxu0  ;;  %v597_v4 = vpop.f32.mrf.mxu1 }
 0x118   : > { %v1792_v54 = vrot.slane %v597_v4, 4 }
 0x119   : > { %v2195_v56 = vpop.f32.mrf.mxu0  ;;  %v2230_v55 = vpop.f32.mrf.mxu1 }
 0x11a   : > { %v1804_v32 = vsel %vm1803_vm0, %v431_v53, %v1792_v54 }
 0x141   : > { %v763_v16 = vpop.f32.mrf.mxu0 }
 0x143   : > { %v929_v8 = vpop.f32.mrf.mxu1  ;;  %v2265_v34 = vpop.f32.mrf.mxu0 }
 0x144   : > { %v1795_v27 = vrot.slane %v929_v8, 4 }
 0x145   : > { %v2300_v6 = vpop.f32.mrf.mxu1 }
 0x146   : > { %v1805_v28 = vsel %vm1803_vm0, %v763_v16, %v1795_v27 }
 0x16f   : > { %v1109_v9 = vpop.f32.mrf.mxu0 }
 0x170   : > { %v1275_v10 = vpop.f32.mrf.mxu1 }
 0x171   : > { %v1798_v11 = vrot.slane %v1275_v10, 4  ;;  %v2335_v15 = vpop.f32.mrf.mxu0 }
 0x172   : > { %v2370_v22 = vpop.f32.mrf.mxu1 }
 0x173   : > { %v1806_v21 = vsel %vm1803_vm0, %v1109_v9, %v1798_v11 }
 0x19b   : > { %v1441_v62 = vpop.f32.mrf.mxu0 }
 0x19c   : > { %v1607_v36 = vpop.f32.mrf.mxu1 }
 0x19d   : > { %v2405_v24 = vpop.f32.mrf.mxu0  ;;  %v1801_v5 = vrot.slane %v1607_v36, 4 }
 0x19e   : > { %v2440_v48 = vpop.f32.mrf.mxu1 }
 0x19f   : > { %v1807_v63 = vsel %vm1803_vm0, %v1441_v62, %v1801_v5 }
 0x1c2   : > { %v1787_v25 = vpop.f32.mrf.mxu0 }
 0x1c3   : > { %2477 = vmatpush3.msk.msra.mxu1 %vm1803_vm0, %v1787_v25 }
 0x1c4   : > { %v2475_v52 = vpop.f32.mrf.mxu0  ;;  %2478 = vmatprep.subr.mxu1 %v2628_v1 }
 0x1c5   : > { %2479 = vmatpush3.msra.mxu1 %v1807_v63 }
 0x1c6   : > { %2480 = vmatprep.subr.mxu1 %v2628_v1 }
 0x1c7   : > { %2481 = vmatpush3.msra.mxu1 %v1806_v21 }
 0x1c8   : > { %2482 = vmatprep.subr.mxu1 %v2628_v1 }
 0x1c9   : > { %2483 = vmatpush3.msra.mxu1 %v1805_v28 }
 0x1ca   : > { %2484 = vmatprep.subr.mxu1 %v2628_v1 }
 0x1cb   : > { %2485 = vmatpush3.msra.mxu1 %v1804_v32 }
 0x1cc   : > { %2487 = vmatmul.mubr.msk.f32.vlgmr.msra.gmra.mxu1 %vm1809_vm13, %v1808_v30 }
 0x28c   : > { %v1882_v49 = vpop.f32.mrf.mxu1 }
 0x28d   : > { %1886 = vst [vmem:[%s198_s18] sm:$0xff] %v1882_v49 }
 0x28e   : > { %v2488_v1 = vpop.f32.mrf.mxu1 }
 0x28f   : > { %2563 = shalt.err (!%p2560_p5)
}
 0x290   : > { %s2564_s5 = scalar_lea.hbm %s3639_s27, 128  ;;  %s2568_s8 = scalar_lea.hbm %s3686_s3, 256 }
 0x291   : > { %p2565_p6 = scmp.ne.s32.totalorder %s3639_s27, %s2564_s5  ;;  %p2569_p10 = scmp.lt.s32.totalorder %s3639_s27, %s3686_s3 }
 0x292   : > { %p2570_p11 = scmp.lt.s32.totalorder %s2568_s8, %s2564_s5 }
 0x293   : > { %p2566_p7 = pnand %p2565_p6, %p2692_p4 }
 0x294   : > { %p2571_p12 = por %p2570_p11, %p2569_p10 }
 0x295   : > { %p2567_p9 = pneg %p2566_p7 }
 0x297   : > { %p2572_p13 = pnand %p2571_p12, %p2567_p9 }
 0x299   : > { %2575 = shalt.err (!%p2572_p13)
}
 0x29a   : > { %2490 = dma.vmem_to_hbm [thread:$0]  (%p2692_p4), %s3634_s19, 128, %s3639_s27, %s1888_s28  }
 0x29b PF: > { %p2496_p0 = scmp.ge.s32.totalorder %s2626_s17, 2  ;;  %s1914_s11 = sand.u32 1, %s2606_s12  }
 0x29c   : > { %s1915_s18 = scalar_lea.sflag [#allocation3], %s1914_s11 }
 0x29d   : > { %p2493_p1 = pnand %p2496_p0, %p2699_p8 }
 0x29f   : > { %p2494_p2 = pneg %p2493_p1 }
 0x2a1   : > { %2601 = dma.done.wait (%p2494_p2), %s1915_s18, 128  }
 0x2a2   : > { %2603 = vsyncadd (%p2494_p2), %s1915_s18, 4294967168  ;;  %s16_s17 = sadd.s32 1, %s2626_s17   ;;  %s3713_s12 = smov %s2610_s13 }
 0x2a3   : > { %p13_p3 = scmp.ge.s32.totalorder %s16_s17, 4   ;;  %s3714_s13 = smov %s2614_s14 }
 0x2a4   : > { %s3715_s14 = smov %s2705_s25  ;;  %s3716_s15 = smov %s2622_s16 }
 0x2a5   : > { %s3717_s16 = smov %s3719_s20  ;;  %15 = sbr.rel (!%p13_p3) target bundleno = 4 (0x4), region = 70 }
 0x2aa   :  { %1920 = vsyncpa [#allocation3], 1 }
 0x2ab   :  { %1922 = vsyncpa [#allocation3 + $0x1], 1 }

</bundles_post_ra>
